<compile_context>
chip_gen: v7x
topology: tpu7x:2x2x1
jax: 0.10.0
libtpu: 0.0.40
codegen_flags: <defaults>
</compile_context>

<pallas_src>
import functools

import jax
import jax.numpy as jnp
import numpy as np
from jax import lax
from jax.experimental import pallas as pl
from jax.experimental.pallas import tpu as pltpu


def _conv_dw_kernel(x_ref, wdw_ref, s1_ref, b1_ref, wpw_ref, s2_ref, b2_ref,
                    wmask_ref, o_ref, xpad_ref, *,
                    stride, W, pad, mask_is_trivial):
    """One batch element per grid step.

    x_ref    : (C, H*W)          VMEM  flat NCHW activations (lane dim = H*W)
    wdw_ref  : (C, 9)            SMEM  depthwise 3x3 weights (scalar per tap)
    s1/b1    : (C,)              SMEM  folded BN1 scale / bias
    wpw_ref  : (C, O, 1)         VMEM  pointwise weights (per-c column)
    s2/b2    : (O, 1)            VMEM  folded BN2 scale / bias
    wmask_ref: (3, L)            VMEM  w-boundary masks per kw tap (0/1)
    o_ref    : (O, L)            VMEM  lane-dense output block
    xpad_ref : (C, pad+HW+pad)   VMEM  scratch: zero-halo'd flat input
    """
    C, HW = x_ref.shape
    O, L = o_ref.shape

    # Build the zero halo + interior copy every step (grid axis is "parallel",
    # so no cross-iteration state is allowed).  Interior store is lane-aligned
    # (pad is a multiple of 128) and dense.
    xpad_ref[:, :pad] = jnp.zeros((C, pad), jnp.float32)
    xpad_ref[:, pad + HW:] = jnp.zeros((C, pad), jnp.float32)
    xpad_ref[:, pad:pad + HW] = x_ref[...].astype(jnp.float32)

    # Hoist the three kw-boundary masks out of the channel/tap loops.
    masks = [None if mask_is_trivial[kw] else wmask_ref[kw:kw + 1, :]
             for kw in range(3)]

    z = jnp.zeros((O, L), jnp.float32)
    for c in range(C):   # small C: fully unrolled VPU work (no MXU needed)
        # ---- depthwise 3x3 for channel c: shifted-MAC on the flat layout ----
        acc = jnp.zeros((1, L), jnp.float32)
        for kh in range(3):
            for kw in range(3):
                off = pad + (kh - 1) * W + (kw - 1)
                if stride == 1:
                    v = xpad_ref[pl.ds(c, 1), pl.ds(off, L)]
                else:
                    # stride>1: one strided lane load per tap (m-space output).
                    v = xpad_ref[pl.ds(c, 1), pl.ds(off, L, stride=stride)]
                if masks[kw] is not None:
                    v = v * masks[kw]                       # pad=1 w-boundary
                acc = acc + v * wdw_ref[c, kh * 3 + kw]     # SMEM scalar MAC
        # ---- BN1 (folded) + ReLU ----
        y_c = jnp.maximum(acc * s1_ref[c] + b1_ref[c], 0.0)
        # ---- 1x1 pointwise as VPU outer-product MAC: (O,1) * (1,L) ----
        z = z + wpw_ref[c] * y_c

    # ---- BN2 (folded) + ReLU; one dense (O, L) store (L >= 128 lanes) ----
    o_ref[...] = jnp.maximum(z * s2_ref[...] + b2_ref[...],
                             0.0).astype(o_ref.dtype)


def conv_dw_m_forward(x_nchw, params, stride):
    """Fused dw3x3 -> BN -> ReLU -> pw1x1 -> BN -> ReLU.  NCHW in / NCHW out."""
    w_dw = params["w_dw"]                 # (3, 3, C)
    w_pw = params["w_pw"]                 # (C, O)
    s1, b1 = params["s1"], params["b1"]   # (1, C)
    s2, b2 = params["s2"], params["b2"]   # (1, O)

    N, C, H, W = x_nchw.shape
    O = w_pw.shape[1]
    Ho = (H - 1) // stride + 1            # k=3, pad=1
    Wo = (W - 1) // stride + 1
    HW = H * W
    # Kernel computes in "m-space" (m = ho*W + wo).  stride==1: that IS the
    # flat output.  stride>1: wrapper trims the unused columns afterwards
    # (output is 1/stride^2 the size, so the trim is cheap).
    L = HW if stride == 1 else Ho * W
    # Halo: >= W+1 on the left, >= stride*(W-1)+2 on the right; round up to a
    # multiple of 128 so the interior copy is a lane-aligned dense store.
    pad = int(np.ceil(max(W + 1, stride * (W - 1) + 2) / 128.0)) * 128

    # Free reshape (contiguous): (N,C,H,W) -> (N,C,H*W).  Channels stay on
    # sublanes, the spatial dim (>=128) lands on the lane dimension.
    x_flat = x_nchw.reshape(N, C, HW)

    # One-time tiny weight re-layouts (C*9 + C*O elements), outside the hot
    # activation path; in real use these would be pre-folded offline.
    wdw_s = jnp.transpose(w_dw, (2, 0, 1)).reshape(C, 9)
    s1_s = s1.reshape(C)
    b1_s = b1.reshape(C)
    wpw_v = w_pw.reshape(C, O, 1)
    s2_v = s2.reshape(O, 1)
    b2_v = b2.reshape(O, 1)

    # Static w-boundary masks per kw tap (replaces the HBM-side jnp.pad).
    wo_m = np.arange(L) % W
    wmask_np = np.zeros((3, L), np.float32)
    for kw in range(3):
        wi = stride * wo_m + (kw - 1)
        wmask_np[kw] = ((wi >= 0) & (wi < W)).astype(np.float32)
    mask_is_trivial = tuple(bool(wmask_np[kw].all()) for kw in range(3))
    wmask = jnp.asarray(wmask_np)

    kernel = functools.partial(_conv_dw_kernel, stride=stride, W=W, pad=pad,
                               mask_is_trivial=mask_is_trivial)

    smem_spec = pl.BlockSpec(memory_space=pltpu.MemorySpace.SMEM)
    grid_spec = pltpu.PrefetchScalarGridSpec(
        num_scalar_prefetch=0,
        grid=(N,),                                            # batch element / step
        in_specs=[
            pl.BlockSpec((None, C, HW), lambda n: (n, 0, 0)),  # activations
            smem_spec,                                         # dw weights
            smem_spec,                                         # BN1 scale
            smem_spec,                                         # BN1 bias
            pl.BlockSpec((C, O, 1), lambda n: (0, 0, 0)),      # pw weights
            pl.BlockSpec((O, 1), lambda n: (0, 0)),            # BN2 scale
            pl.BlockSpec((O, 1), lambda n: (0, 0)),            # BN2 bias
            pl.BlockSpec((3, L), lambda n: (0, 0)),            # kw masks
        ],
        out_specs=pl.BlockSpec((None, O, L), lambda n: (n, 0, 0)),
        scratch_shapes=[pltpu.VMEM((C, 2 * pad + HW), jnp.float32)],
    )

    flops = 2 * N * Ho * Wo * C * (9 + O)
    bytes_accessed = 4 * (x_flat.size + N * O * L + wdw_s.size + wpw_v.size
                          + 2 * C + 2 * O + wmask.size)

    out_flat = pl.pallas_call(
        kernel,
        grid_spec=grid_spec,
        out_shape=jax.ShapeDtypeStruct((N, O, L), jnp.float32),
        compiler_params=pltpu.CompilerParams(
            dimension_semantics=("parallel",),   # shard batch across TCs (v7x)
            vmem_limit_bytes=32 * 1024 * 1024,
        ),
        cost_estimate=pl.CostEstimate(
            flops=flops, transcendentals=0, bytes_accessed=bytes_accessed),
    )(x_flat, wdw_s, s1_s, b1_s, wpw_v, s2_v, b2_v, wmask)

    if stride == 1:
        return out_flat.reshape(N, O, Ho, Wo)    # free (contiguous) reshape
    # stride > 1: kernel produced full-W rows in m-space; trim unused columns.
    return out_flat.reshape(N, O, Ho, W)[:, :, :, :Wo]


def make_params(key, inp, oup):
    """Deterministic parameter init; BN (eval mode) folded to scale/bias."""
    ks = jax.random.split(key, 8)
    eps = 1e-5

    # Depthwise Conv2d(inp, inp, 3, groups=inp): torch (inp,1,3,3) -> (3,3,inp)
    w_dw = 0.1 * jax.random.normal(ks[0], (3, 3, inp), jnp.float32)
    # Pointwise Conv2d(inp, oup, 1): torch (oup,inp,1,1) -> (inp,oup)
    w_pw = 0.1 * jax.random.normal(ks[1], (inp, oup), jnp.float32)

    g1 = 1.0 + 0.1 * jax.random.normal(ks[2], (inp,), jnp.float32)
    be1 = 0.05 * jax.random.normal(ks[3], (inp,), jnp.float32)
    rm1 = 0.1 * jax.random.normal(ks[4], (inp,), jnp.float32)
    rv1 = 0.5 + 0.5 * jnp.abs(jax.random.normal(ks[5], (inp,), jnp.float32))
    s1 = g1 / jnp.sqrt(rv1 + eps)
    b1 = be1 - rm1 * s1

    g2 = 1.0 + 0.1 * jax.random.normal(ks[6], (oup,), jnp.float32)
    be2 = 0.05 * jax.random.normal(ks[7], (oup,), jnp.float32)
    rm2 = jnp.zeros((oup,), jnp.float32)
    rv2 = jnp.ones((oup,), jnp.float32)
    s2 = g2 / jnp.sqrt(rv2 + eps)
    b2 = be2 - rm2 * s2

    return {
        "w_dw": w_dw,
        "w_pw": w_pw,
        "s1": s1.reshape(1, inp), "b1": b1.reshape(1, inp),
        "s2": s2.reshape(1, oup), "b2": b2.reshape(1, oup),
    }


def reference_forward(x_nchw, params, stride):
    """Pure-JAX (XLA conv) reference with identical math, for verification."""
    w_dw = params["w_dw"]
    w_pw = params["w_pw"]
    s1, b1 = params["s1"][0], params["b1"][0]
    s2, b2 = params["s2"][0], params["b2"][0]

    C = x_nchw.shape[1]
    x_nhwc = jnp.transpose(x_nchw, (0, 2, 3, 1))
    dw = lax.conv_general_dilated(
        x_nhwc, w_dw.reshape(3, 3, 1, C),
        window_strides=(stride, stride), padding=((1, 1), (1, 1)),
        dimension_numbers=("NHWC", "HWIO", "NHWC"),
        feature_group_count=C)
    y = jnp.maximum(dw * s1 + b1, 0.0)
    z = jnp.einsum("nhwc,co->nhwo", y, w_pw)
    z = jnp.maximum(z * s2 + b2, 0.0)
    return jnp.transpose(z, (0, 3, 1, 2))


if __name__ == "__main__":
    inp, oup, stride = 4, 8, 1
    N, H, W = 2, 16, 16

    key = jax.random.PRNGKey(0)
    kx, kp = jax.random.split(key)
    x = jax.random.normal(kx, (N, inp, H, W), jnp.float32)   # NCHW like PyTorch
    params = make_params(kp, inp, oup)

    out = conv_dw_m_forward(x, params, stride)
    out = jax.block_until_ready(out)

    ref = jax.block_until_ready(reference_forward(x, params, stride))
    assert out.shape == ref.shape, (out.shape, ref.shape)
    np.testing.assert_allclose(np.asarray(out), np.asarray(ref),
                               rtol=1e-5, atol=1e-5)
    print("KERNEL_OK")
</pallas_src>

<mosaic_0001>
module attributes {stable_mosaic.version = 11 : i64} {
  func.func @_conv_dw_kernel(%arg0: i32, %arg1: memref<1x4x256xf32, #tpu.memory_space<vmem>>, %arg2: memref<4x9xf32, #tpu.memory_space<smem>>, %arg3: memref<4xf32, #tpu.memory_space<smem>>, %arg4: memref<4xf32, #tpu.memory_space<smem>>, %arg5: memref<4x8x1xf32, #tpu.memory_space<vmem>>, %arg6: memref<8x1xf32, #tpu.memory_space<vmem>>, %arg7: memref<8x1xf32, #tpu.memory_space<vmem>>, %arg8: memref<3x256xf32, #tpu.memory_space<vmem>>, %arg9: memref<1x8x256xf32, #tpu.memory_space<vmem>>, %arg10: memref<4x512xf32, #tpu.memory_space<vmem>>) attributes {dimension_semantics = [#tpu.dimension_semantics<parallel>], iteration_bounds = array<i64: 2>, scalar_prefetch = 0 : i64, scratch_operands = 1 : i64, tpu.core_type = #tpu.core_type<tc>, window_params = [{transform_indices = @transform_0, window_bounds = array<i64: 1, 4, 256>}, {transform_indices = @transform_1, window_bounds = array<i64: 4, 9>}, {transform_indices = @transform_2, window_bounds = array<i64: 4>}, {transform_indices = @transform_3, window_bounds = array<i64: 4>}, {pipeline_mode = #tpu.pipeline_mode<synchronous>, transform_indices = @transform_4, window_bounds = array<i64: 4, 8, 1>}, {pipeline_mode = #tpu.pipeline_mode<synchronous>, transform_indices = @transform_5, window_bounds = array<i64: 8, 1>}, {pipeline_mode = #tpu.pipeline_mode<synchronous>, transform_indices = @transform_6, window_bounds = array<i64: 8, 1>}, {pipeline_mode = #tpu.pipeline_mode<synchronous>, transform_indices = @transform_7, window_bounds = array<i64: 3, 256>}, {transform_indices = @transform_8, window_bounds = array<i64: 1, 8, 256>}]} {
    %cst = arith.constant 0.000000e+00 : f32
    %0 = vector.broadcast %cst : f32 to vector<4x128xf32>
    %c0 = arith.constant 0 : index
    %c0_0 = arith.constant 0 : index
    %1 = vector.load %arg10[%c0, %c0_0] : memref<4x512xf32, #tpu.memory_space<vmem>>, vector<4x128xf32>
    tpu.vector_store %arg10[%c0, %c0_0], %0 {strides = array<i32>} : memref<4x512xf32, #tpu.memory_space<vmem>>, vector<4x128xf32>,
    %cst_1 = arith.constant 0.000000e+00 : f32
    %2 = vector.broadcast %cst_1 : f32 to vector<4x128xf32>
    %c0_2 = arith.constant 0 : index
    %c384 = arith.constant 384 : index
    %3 = vector.load %arg10[%c0_2, %c384] : memref<4x512xf32, #tpu.memory_space<vmem>>, vector<4x128xf32>
    tpu.vector_store %arg10[%c0_2, %c384], %2 {strides = array<i32>} : memref<4x512xf32, #tpu.memory_space<vmem>>, vector<4x128xf32>,
    %c0_3 = arith.constant 0 : index
    %c0_4 = arith.constant 0 : index
    %c0_5 = arith.constant 0 : index
    %4 = vector.load %arg1[%c0_3, %c0_4, %c0_5] : memref<1x4x256xf32, #tpu.memory_space<vmem>>, vector<1x4x256xf32>
    %5 = vector.shape_cast %4 : vector<1x4x256xf32> to vector<4x256xf32>
    %c0_6 = arith.constant 0 : index
    %c128 = arith.constant 128 : index
    %6 = vector.load %arg10[%c0_6, %c128] : memref<4x512xf32, #tpu.memory_space<vmem>>, vector<4x256xf32>
    tpu.vector_store %arg10[%c0_6, %c128], %5 {strides = array<i32>} : memref<4x512xf32, #tpu.memory_space<vmem>>, vector<4x256xf32>,
    %c0_7 = arith.constant 0 : index
    %c0_8 = arith.constant 0 : index
    %7 = vector.load %arg8[%c0_7, %c0_8] : memref<3x256xf32, #tpu.memory_space<vmem>>, vector<1x256xf32>
    %c2 = arith.constant 2 : index
    %c0_9 = arith.constant 0 : index
    %8 = vector.load %arg8[%c2, %c0_9] : memref<3x256xf32, #tpu.memory_space<vmem>>, vector<1x256xf32>
    %cst_10 = arith.constant 0.000000e+00 : f32
    %9 = vector.broadcast %cst_10 : f32 to vector<8x256xf32>
    %cst_11 = arith.constant 0.000000e+00 : f32
    %10 = vector.broadcast %cst_11 : f32 to vector<1x256xf32>
    %c0_12 = arith.constant 0 : index
    %c111 = arith.constant 111 : index
    %11 = vector.load %arg10[%c0_12, %c111] : memref<4x512xf32, #tpu.memory_space<vmem>>, vector<1x256xf32>
    %12 = arith.mulf %11, %7 : vector<1x256xf32>
    %c0_13 = arith.constant 0 : index
    %c0_14 = arith.constant 0 : index
    %13 = memref.load %arg2[%c0_13, %c0_14] : memref<4x9xf32, #tpu.memory_space<smem>>
    %14 = vector.broadcast %13 : f32 to vector<1x256xf32>
    %15 = arith.mulf %12, %14 : vector<1x256xf32>
    %16 = arith.addf %10, %15 : vector<1x256xf32>
    %c0_15 = arith.constant 0 : index
    %c112 = arith.constant 112 : index
    %17 = vector.load %arg10[%c0_15, %c112] : memref<4x512xf32, #tpu.memory_space<vmem>>, vector<1x256xf32>
    %c0_16 = arith.constant 0 : index
    %c1 = arith.constant 1 : index
    %18 = memref.load %arg2[%c0_16, %c1] : memref<4x9xf32, #tpu.memory_space<smem>>
    %19 = vector.broadcast %18 : f32 to vector<1x256xf32>
    %20 = arith.mulf %17, %19 : vector<1x256xf32>
    %21 = arith.addf %16, %20 : vector<1x256xf32>
    %c0_17 = arith.constant 0 : index
    %c113 = arith.constant 113 : index
    %22 = vector.load %arg10[%c0_17, %c113] : memref<4x512xf32, #tpu.memory_space<vmem>>, vector<1x256xf32>
    %23 = arith.mulf %22, %8 : vector<1x256xf32>
    %c0_18 = arith.constant 0 : index
    %c2_19 = arith.constant 2 : index
    %24 = memref.load %arg2[%c0_18, %c2_19] : memref<4x9xf32, #tpu.memory_space<smem>>
    %25 = vector.broadcast %24 : f32 to vector<1x256xf32>
    %26 = arith.mulf %23, %25 : vector<1x256xf32>
    %27 = arith.addf %21, %26 : vector<1x256xf32>
    %c0_20 = arith.constant 0 : index
    %c127 = arith.constant 127 : index
    %28 = vector.load %arg10[%c0_20, %c127] : memref<4x512xf32, #tpu.memory_space<vmem>>, vector<1x256xf32>
    %29 = arith.mulf %28, %7 : vector<1x256xf32>
    %c0_21 = arith.constant 0 : index
    %c3 = arith.constant 3 : index
    %30 = memref.load %arg2[%c0_21, %c3] : memref<4x9xf32, #tpu.memory_space<smem>>
    %31 = vector.broadcast %30 : f32 to vector<1x256xf32>
    %32 = arith.mulf %29, %31 : vector<1x256xf32>
    %33 = arith.addf %27, %32 : vector<1x256xf32>
    %c0_22 = arith.constant 0 : index
    %c128_23 = arith.constant 128 : index
    %34 = vector.load %arg10[%c0_22, %c128_23] : memref<4x512xf32, #tpu.memory_space<vmem>>, vector<1x256xf32>
    %c0_24 = arith.constant 0 : index
    %c4 = arith.constant 4 : index
    %35 = memref.load %arg2[%c0_24, %c4] : memref<4x9xf32, #tpu.memory_space<smem>>
    %36 = vector.broadcast %35 : f32 to vector<1x256xf32>
    %37 = arith.mulf %34, %36 : vector<1x256xf32>
    %38 = arith.addf %33, %37 : vector<1x256xf32>
    %c0_25 = arith.constant 0 : index
    %c129 = arith.constant 129 : index
    %39 = vector.load %arg10[%c0_25, %c129] : memref<4x512xf32, #tpu.memory_space<vmem>>, vector<1x256xf32>
    %40 = arith.mulf %39, %8 : vector<1x256xf32>
    %c0_26 = arith.constant 0 : index
    %c5 = arith.constant 5 : index
    %41 = memref.load %arg2[%c0_26, %c5] : memref<4x9xf32, #tpu.memory_space<smem>>
    %42 = vector.broadcast %41 : f32 to vector<1x256xf32>
    %43 = arith.mulf %40, %42 : vector<1x256xf32>
    %44 = arith.addf %38, %43 : vector<1x256xf32>
    %c0_27 = arith.constant 0 : index
    %c143 = arith.constant 143 : index
    %45 = vector.load %arg10[%c0_27, %c143] : memref<4x512xf32, #tpu.memory_space<vmem>>, vector<1x256xf32>
    %46 = arith.mulf %45, %7 : vector<1x256xf32>
    %c0_28 = arith.constant 0 : index
    %c6 = arith.constant 6 : index
    %47 = memref.load %arg2[%c0_28, %c6] : memref<4x9xf32, #tpu.memory_space<smem>>
    %48 = vector.broadcast %47 : f32 to vector<1x256xf32>
    %49 = arith.mulf %46, %48 : vector<1x256xf32>
    %50 = arith.addf %44, %49 : vector<1x256xf32>
    %c0_29 = arith.constant 0 : index
    %c144 = arith.constant 144 : index
    %51 = vector.load %arg10[%c0_29, %c144] : memref<4x512xf32, #tpu.memory_space<vmem>>, vector<1x256xf32>
    %c0_30 = arith.constant 0 : index
    %c7 = arith.constant 7 : index
    %52 = memref.load %arg2[%c0_30, %c7] : memref<4x9xf32, #tpu.memory_space<smem>>
    %53 = vector.broadcast %52 : f32 to vector<1x256xf32>
    %54 = arith.mulf %51, %53 : vector<1x256xf32>
    %55 = arith.addf %50, %54 : vector<1x256xf32>
    %c0_31 = arith.constant 0 : index
    %c145 = arith.constant 145 : index
    %56 = vector.load %arg10[%c0_31, %c145] : memref<4x512xf32, #tpu.memory_space<vmem>>, vector<1x256xf32>
    %57 = arith.mulf %56, %8 : vector<1x256xf32>
    %c0_32 = arith.constant 0 : index
    %c8 = arith.constant 8 : index
    %58 = memref.load %arg2[%c0_32, %c8] : memref<4x9xf32, #tpu.memory_space<smem>>
    %59 = vector.broadcast %58 : f32 to vector<1x256xf32>
    %60 = arith.mulf %57, %59 : vector<1x256xf32>
    %61 = arith.addf %55, %60 : vector<1x256xf32>
    %c0_33 = arith.constant 0 : index
    %62 = memref.load %arg3[%c0_33] : memref<4xf32, #tpu.memory_space<smem>>
    %63 = vector.broadcast %62 : f32 to vector<1x256xf32>
    %64 = arith.mulf %61, %63 : vector<1x256xf32>
    %c0_34 = arith.constant 0 : index
    %65 = memref.load %arg4[%c0_34] : memref<4xf32, #tpu.memory_space<smem>>
    %66 = vector.broadcast %65 : f32 to vector<1x256xf32>
    %67 = arith.addf %64, %66 : vector<1x256xf32>
    %cst_35 = arith.constant 0.000000e+00 : f32
    %68 = vector.broadcast %cst_35 : f32 to vector<1x256xf32>
    %69 = arith.maximumf %67, %68 : vector<1x256xf32>
    %c0_36 = arith.constant 0 : index
    %c0_37 = arith.constant 0 : index
    %c0_38 = arith.constant 0 : index
    %70 = vector.load %arg5[%c0_36, %c0_37, %c0_38] : memref<4x8x1xf32, #tpu.memory_space<vmem>>, vector<1x8x1xf32>
    %71 = vector.shape_cast %70 : vector<1x8x1xf32> to vector<8x1xf32>
    %72 = vector.broadcast %71 : vector<8x1xf32> to vector<8x256xf32>
    %73 = vector.broadcast %69 : vector<1x256xf32> to vector<8x256xf32>
    %74 = arith.mulf %72, %73 : vector<8x256xf32>
    %75 = arith.addf %9, %74 : vector<8x256xf32>
    %cst_39 = arith.constant 0.000000e+00 : f32
    %76 = vector.broadcast %cst_39 : f32 to vector<1x256xf32>
    %c1_40 = arith.constant 1 : index
    %c111_41 = arith.constant 111 : index
    %77 = vector.load %arg10[%c1_40, %c111_41] : memref<4x512xf32, #tpu.memory_space<vmem>>, vector<1x256xf32>
    %78 = arith.mulf %77, %7 : vector<1x256xf32>
    %c1_42 = arith.constant 1 : index
    %c0_43 = arith.constant 0 : index
    %79 = memref.load %arg2[%c1_42, %c0_43] : memref<4x9xf32, #tpu.memory_space<smem>>
    %80 = vector.broadcast %79 : f32 to vector<1x256xf32>
    %81 = arith.mulf %78, %80 : vector<1x256xf32>
    %82 = arith.addf %76, %81 : vector<1x256xf32>
    %c1_44 = arith.constant 1 : index
    %c112_45 = arith.constant 112 : index
    %83 = vector.load %arg10[%c1_44, %c112_45] : memref<4x512xf32, #tpu.memory_space<vmem>>, vector<1x256xf32>
    %c1_46 = arith.constant 1 : index
    %c1_47 = arith.constant 1 : index
    %84 = memref.load %arg2[%c1_46, %c1_47] : memref<4x9xf32, #tpu.memory_space<smem>>
    %85 = vector.broadcast %84 : f32 to vector<1x256xf32>
    %86 = arith.mulf %83, %85 : vector<1x256xf32>
    %87 = arith.addf %82, %86 : vector<1x256xf32>
    %c1_48 = arith.constant 1 : index
    %c113_49 = arith.constant 113 : index
    %88 = vector.load %arg10[%c1_48, %c113_49] : memref<4x512xf32, #tpu.memory_space<vmem>>, vector<1x256xf32>
    %89 = arith.mulf %88, %8 : vector<1x256xf32>
    %c1_50 = arith.constant 1 : index
    %c2_51 = arith.constant 2 : index
    %90 = memref.load %arg2[%c1_50, %c2_51] : memref<4x9xf32, #tpu.memory_space<smem>>
    %91 = vector.broadcast %90 : f32 to vector<1x256xf32>
    %92 = arith.mulf %89, %91 : vector<1x256xf32>
    %93 = arith.addf %87, %92 : vector<1x256xf32>
    %c1_52 = arith.constant 1 : index
    %c127_53 = arith.constant 127 : index
    %94 = vector.load %arg10[%c1_52, %c127_53] : memref<4x512xf32, #tpu.memory_space<vmem>>, vector<1x256xf32>
    %95 = arith.mulf %94, %7 : vector<1x256xf32>
    %c1_54 = arith.constant 1 : index
    %c3_55 = arith.constant 3 : index
    %96 = memref.load %arg2[%c1_54, %c3_55] : memref<4x9xf32, #tpu.memory_space<smem>>
    %97 = vector.broadcast %96 : f32 to vector<1x256xf32>
    %98 = arith.mulf %95, %97 : vector<1x256xf32>
    %99 = arith.addf %93, %98 : vector<1x256xf32>
    %c1_56 = arith.constant 1 : index
    %c128_57 = arith.constant 128 : index
    %100 = vector.load %arg10[%c1_56, %c128_57] : memref<4x512xf32, #tpu.memory_space<vmem>>, vector<1x256xf32>
    %c1_58 = arith.constant 1 : index
    %c4_59 = arith.constant 4 : index
    %101 = memref.load %arg2[%c1_58, %c4_59] : memref<4x9xf32, #tpu.memory_space<smem>>
    %102 = vector.broadcast %101 : f32 to vector<1x256xf32>
    %103 = arith.mulf %100, %102 : vector<1x256xf32>
    %104 = arith.addf %99, %103 : vector<1x256xf32>
    %c1_60 = arith.constant 1 : index
    %c129_61 = arith.constant 129 : index
    %105 = vector.load %arg10[%c1_60, %c129_61] : memref<4x512xf32, #tpu.memory_space<vmem>>, vector<1x256xf32>
    %106 = arith.mulf %105, %8 : vector<1x256xf32>
    %c1_62 = arith.constant 1 : index
    %c5_63 = arith.constant 5 : index
    %107 = memref.load %arg2[%c1_62, %c5_63] : memref<4x9xf32, #tpu.memory_space<smem>>
    %108 = vector.broadcast %107 : f32 to vector<1x256xf32>
    %109 = arith.mulf %106, %108 : vector<1x256xf32>
    %110 = arith.addf %104, %109 : vector<1x256xf32>
    %c1_64 = arith.constant 1 : index
    %c143_65 = arith.constant 143 : index
    %111 = vector.load %arg10[%c1_64, %c143_65] : memref<4x512xf32, #tpu.memory_space<vmem>>, vector<1x256xf32>
    %112 = arith.mulf %111, %7 : vector<1x256xf32>
    %c1_66 = arith.constant 1 : index
    %c6_67 = arith.constant 6 : index
    %113 = memref.load %arg2[%c1_66, %c6_67] : memref<4x9xf32, #tpu.memory_space<smem>>
    %114 = vector.broadcast %113 : f32 to vector<1x256xf32>
    %115 = arith.mulf %112, %114 : vector<1x256xf32>
    %116 = arith.addf %110, %115 : vector<1x256xf32>
    %c1_68 = arith.constant 1 : index
    %c144_69 = arith.constant 144 : index
    %117 = vector.load %arg10[%c1_68, %c144_69] : memref<4x512xf32, #tpu.memory_space<vmem>>, vector<1x256xf32>
    %c1_70 = arith.constant 1 : index
    %c7_71 = arith.constant 7 : index
    %118 = memref.load %arg2[%c1_70, %c7_71] : memref<4x9xf32, #tpu.memory_space<smem>>
    %119 = vector.broadcast %118 : f32 to vector<1x256xf32>
    %120 = arith.mulf %117, %119 : vector<1x256xf32>
    %121 = arith.addf %116, %120 : vector<1x256xf32>
    %c1_72 = arith.constant 1 : index
    %c145_73 = arith.constant 145 : index
    %122 = vector.load %arg10[%c1_72, %c145_73] : memref<4x512xf32, #tpu.memory_space<vmem>>, vector<1x256xf32>
    %123 = arith.mulf %122, %8 : vector<1x256xf32>
    %c1_74 = arith.constant 1 : index
    %c8_75 = arith.constant 8 : index
    %124 = memref.load %arg2[%c1_74, %c8_75] : memref<4x9xf32, #tpu.memory_space<smem>>
    %125 = vector.broadcast %124 : f32 to vector<1x256xf32>
    %126 = arith.mulf %123, %125 : vector<1x256xf32>
    %127 = arith.addf %121, %126 : vector<1x256xf32>
    %c1_76 = arith.constant 1 : index
    %128 = memref.load %arg3[%c1_76] : memref<4xf32, #tpu.memory_space<smem>>
    %129 = vector.broadcast %128 : f32 to vector<1x256xf32>
    %130 = arith.mulf %127, %129 : vector<1x256xf32>
    %c1_77 = arith.constant 1 : index
    %131 = memref.load %arg4[%c1_77] : memref<4xf32, #tpu.memory_space<smem>>
    %132 = vector.broadcast %131 : f32 to vector<1x256xf32>
    %133 = arith.addf %130, %132 : vector<1x256xf32>
    %cst_78 = arith.constant 0.000000e+00 : f32
    %134 = vector.broadcast %cst_78 : f32 to vector<1x256xf32>
    %135 = arith.maximumf %133, %134 : vector<1x256xf32>
    %c1_79 = arith.constant 1 : index
    %c0_80 = arith.constant 0 : index
    %c0_81 = arith.constant 0 : index
    %136 = vector.load %arg5[%c1_79, %c0_80, %c0_81] : memref<4x8x1xf32, #tpu.memory_space<vmem>>, vector<1x8x1xf32>
    %137 = vector.shape_cast %136 : vector<1x8x1xf32> to vector<8x1xf32>
    %138 = vector.broadcast %137 : vector<8x1xf32> to vector<8x256xf32>
    %139 = vector.broadcast %135 : vector<1x256xf32> to vector<8x256xf32>
    %140 = arith.mulf %138, %139 : vector<8x256xf32>
    %141 = arith.addf %75, %140 : vector<8x256xf32>
    %cst_82 = arith.constant 0.000000e+00 : f32
    %142 = vector.broadcast %cst_82 : f32 to vector<1x256xf32>
    %c2_83 = arith.constant 2 : index
    %c111_84 = arith.constant 111 : index
    %143 = vector.load %arg10[%c2_83, %c111_84] : memref<4x512xf32, #tpu.memory_space<vmem>>, vector<1x256xf32>
    %144 = arith.mulf %143, %7 : vector<1x256xf32>
    %c2_85 = arith.constant 2 : index
    %c0_86 = arith.constant 0 : index
    %145 = memref.load %arg2[%c2_85, %c0_86] : memref<4x9xf32, #tpu.memory_space<smem>>
    %146 = vector.broadcast %145 : f32 to vector<1x256xf32>
    %147 = arith.mulf %144, %146 : vector<1x256xf32>
    %148 = arith.addf %142, %147 : vector<1x256xf32>
    %c2_87 = arith.constant 2 : index
    %c112_88 = arith.constant 112 : index
    %149 = vector.load %arg10[%c2_87, %c112_88] : memref<4x512xf32, #tpu.memory_space<vmem>>, vector<1x256xf32>
    %c2_89 = arith.constant 2 : index
    %c1_90 = arith.constant 1 : index
    %150 = memref.load %arg2[%c2_89, %c1_90] : memref<4x9xf32, #tpu.memory_space<smem>>
    %151 = vector.broadcast %150 : f32 to vector<1x256xf32>
    %152 = arith.mulf %149, %151 : vector<1x256xf32>
    %153 = arith.addf %148, %152 : vector<1x256xf32>
    %c2_91 = arith.constant 2 : index
    %c113_92 = arith.constant 113 : index
    %154 = vector.load %arg10[%c2_91, %c113_92] : memref<4x512xf32, #tpu.memory_space<vmem>>, vector<1x256xf32>
    %155 = arith.mulf %154, %8 : vector<1x256xf32>
    %c2_93 = arith.constant 2 : index
    %c2_94 = arith.constant 2 : index
    %156 = memref.load %arg2[%c2_93, %c2_94] : memref<4x9xf32, #tpu.memory_space<smem>>
    %157 = vector.broadcast %156 : f32 to vector<1x256xf32>
    %158 = arith.mulf %155, %157 : vector<1x256xf32>
    %159 = arith.addf %153, %158 : vector<1x256xf32>
    %c2_95 = arith.constant 2 : index
    %c127_96 = arith.constant 127 : index
    %160 = vector.load %arg10[%c2_95, %c127_96] : memref<4x512xf32, #tpu.memory_space<vmem>>, vector<1x256xf32>
    %161 = arith.mulf %160, %7 : vector<1x256xf32>
    %c2_97 = arith.constant 2 : index
    %c3_98 = arith.constant 3 : index
    %162 = memref.load %arg2[%c2_97, %c3_98] : memref<4x9xf32, #tpu.memory_space<smem>>
    %163 = vector.broadcast %162 : f32 to vector<1x256xf32>
    %164 = arith.mulf %161, %163 : vector<1x256xf32>
    %165 = arith.addf %159, %164 : vector<1x256xf32>
    %c2_99 = arith.constant 2 : index
    %c128_100 = arith.constant 128 : index
    %166 = vector.load %arg10[%c2_99, %c128_100] : memref<4x512xf32, #tpu.memory_space<vmem>>, vector<1x256xf32>
    %c2_101 = arith.constant 2 : index
    %c4_102 = arith.constant 4 : index
    %167 = memref.load %arg2[%c2_101, %c4_102] : memref<4x9xf32, #tpu.memory_space<smem>>
    %168 = vector.broadcast %167 : f32 to vector<1x256xf32>
    %169 = arith.mulf %166, %168 : vector<1x256xf32>
    %170 = arith.addf %165, %169 : vector<1x256xf32>
    %c2_103 = arith.constant 2 : index
    %c129_104 = arith.constant 129 : index
    %171 = vector.load %arg10[%c2_103, %c129_104] : memref<4x512xf32, #tpu.memory_space<vmem>>, vector<1x256xf32>
    %172 = arith.mulf %171, %8 : vector<1x256xf32>
    %c2_105 = arith.constant 2 : index
    %c5_106 = arith.constant 5 : index
    %173 = memref.load %arg2[%c2_105, %c5_106] : memref<4x9xf32, #tpu.memory_space<smem>>
    %174 = vector.broadcast %173 : f32 to vector<1x256xf32>
    %175 = arith.mulf %172, %174 : vector<1x256xf32>
    %176 = arith.addf %170, %175 : vector<1x256xf32>
    %c2_107 = arith.constant 2 : index
    %c143_108 = arith.constant 143 : index
    %177 = vector.load %arg10[%c2_107, %c143_108] : memref<4x512xf32, #tpu.memory_space<vmem>>, vector<1x256xf32>
    %178 = arith.mulf %177, %7 : vector<1x256xf32>
    %c2_109 = arith.constant 2 : index
    %c6_110 = arith.constant 6 : index
    %179 = memref.load %arg2[%c2_109, %c6_110] : memref<4x9xf32, #tpu.memory_space<smem>>
    %180 = vector.broadcast %179 : f32 to vector<1x256xf32>
    %181 = arith.mulf %178, %180 : vector<1x256xf32>
    %182 = arith.addf %176, %181 : vector<1x256xf32>
    %c2_111 = arith.constant 2 : index
    %c144_112 = arith.constant 144 : index
    %183 = vector.load %arg10[%c2_111, %c144_112] : memref<4x512xf32, #tpu.memory_space<vmem>>, vector<1x256xf32>
    %c2_113 = arith.constant 2 : index
    %c7_114 = arith.constant 7 : index
    %184 = memref.load %arg2[%c2_113, %c7_114] : memref<4x9xf32, #tpu.memory_space<smem>>
    %185 = vector.broadcast %184 : f32 to vector<1x256xf32>
    %186 = arith.mulf %183, %185 : vector<1x256xf32>
    %187 = arith.addf %182, %186 : vector<1x256xf32>
    %c2_115 = arith.constant 2 : index
    %c145_116 = arith.constant 145 : index
    %188 = vector.load %arg10[%c2_115, %c145_116] : memref<4x512xf32, #tpu.memory_space<vmem>>, vector<1x256xf32>
    %189 = arith.mulf %188, %8 : vector<1x256xf32>
    %c2_117 = arith.constant 2 : index
    %c8_118 = arith.constant 8 : index
    %190 = memref.load %arg2[%c2_117, %c8_118] : memref<4x9xf32, #tpu.memory_space<smem>>
    %191 = vector.broadcast %190 : f32 to vector<1x256xf32>
    %192 = arith.mulf %189, %191 : vector<1x256xf32>
    %193 = arith.addf %187, %192 : vector<1x256xf32>
    %c2_119 = arith.constant 2 : index
    %194 = memref.load %arg3[%c2_119] : memref<4xf32, #tpu.memory_space<smem>>
    %195 = vector.broadcast %194 : f32 to vector<1x256xf32>
    %196 = arith.mulf %193, %195 : vector<1x256xf32>
    %c2_120 = arith.constant 2 : index
    %197 = memref.load %arg4[%c2_120] : memref<4xf32, #tpu.memory_space<smem>>
    %198 = vector.broadcast %197 : f32 to vector<1x256xf32>
    %199 = arith.addf %196, %198 : vector<1x256xf32>
    %cst_121 = arith.constant 0.000000e+00 : f32
    %200 = vector.broadcast %cst_121 : f32 to vector<1x256xf32>
    %201 = arith.maximumf %199, %200 : vector<1x256xf32>
    %c2_122 = arith.constant 2 : index
    %c0_123 = arith.constant 0 : index
    %c0_124 = arith.constant 0 : index
    %202 = vector.load %arg5[%c2_122, %c0_123, %c0_124] : memref<4x8x1xf32, #tpu.memory_space<vmem>>, vector<1x8x1xf32>
    %203 = vector.shape_cast %202 : vector<1x8x1xf32> to vector<8x1xf32>
    %204 = vector.broadcast %203 : vector<8x1xf32> to vector<8x256xf32>
    %205 = vector.broadcast %201 : vector<1x256xf32> to vector<8x256xf32>
    %206 = arith.mulf %204, %205 : vector<8x256xf32>
    %207 = arith.addf %141, %206 : vector<8x256xf32>
    %cst_125 = arith.constant 0.000000e+00 : f32
    %208 = vector.broadcast %cst_125 : f32 to vector<1x256xf32>
    %c3_126 = arith.constant 3 : index
    %c111_127 = arith.constant 111 : index
    %209 = vector.load %arg10[%c3_126, %c111_127] : memref<4x512xf32, #tpu.memory_space<vmem>>, vector<1x256xf32>
    %210 = arith.mulf %209, %7 : vector<1x256xf32>
    %c3_128 = arith.constant 3 : index
    %c0_129 = arith.constant 0 : index
    %211 = memref.load %arg2[%c3_128, %c0_129] : memref<4x9xf32, #tpu.memory_space<smem>>
    %212 = vector.broadcast %211 : f32 to vector<1x256xf32>
    %213 = arith.mulf %210, %212 : vector<1x256xf32>
    %214 = arith.addf %208, %213 : vector<1x256xf32>
    %c3_130 = arith.constant 3 : index
    %c112_131 = arith.constant 112 : index
    %215 = vector.load %arg10[%c3_130, %c112_131] : memref<4x512xf32, #tpu.memory_space<vmem>>, vector<1x256xf32>
    %c3_132 = arith.constant 3 : index
    %c1_133 = arith.constant 1 : index
    %216 = memref.load %arg2[%c3_132, %c1_133] : memref<4x9xf32, #tpu.memory_space<smem>>
    %217 = vector.broadcast %216 : f32 to vector<1x256xf32>
    %218 = arith.mulf %215, %217 : vector<1x256xf32>
    %219 = arith.addf %214, %218 : vector<1x256xf32>
    %c3_134 = arith.constant 3 : index
    %c113_135 = arith.constant 113 : index
    %220 = vector.load %arg10[%c3_134, %c113_135] : memref<4x512xf32, #tpu.memory_space<vmem>>, vector<1x256xf32>
    %221 = arith.mulf %220, %8 : vector<1x256xf32>
    %c3_136 = arith.constant 3 : index
    %c2_137 = arith.constant 2 : index
    %222 = memref.load %arg2[%c3_136, %c2_137] : memref<4x9xf32, #tpu.memory_space<smem>>
    %223 = vector.broadcast %222 : f32 to vector<1x256xf32>
    %224 = arith.mulf %221, %223 : vector<1x256xf32>
    %225 = arith.addf %219, %224 : vector<1x256xf32>
    %c3_138 = arith.constant 3 : index
    %c127_139 = arith.constant 127 : index
    %226 = vector.load %arg10[%c3_138, %c127_139] : memref<4x512xf32, #tpu.memory_space<vmem>>, vector<1x256xf32>
    %227 = arith.mulf %226, %7 : vector<1x256xf32>
    %c3_140 = arith.constant 3 : index
    %c3_141 = arith.constant 3 : index
    %228 = memref.load %arg2[%c3_140, %c3_141] : memref<4x9xf32, #tpu.memory_space<smem>>
    %229 = vector.broadcast %228 : f32 to vector<1x256xf32>
    %230 = arith.mulf %227, %229 : vector<1x256xf32>
    %231 = arith.addf %225, %230 : vector<1x256xf32>
    %c3_142 = arith.constant 3 : index
    %c128_143 = arith.constant 128 : index
    %232 = vector.load %arg10[%c3_142, %c128_143] : memref<4x512xf32, #tpu.memory_space<vmem>>, vector<1x256xf32>
    %c3_144 = arith.constant 3 : index
    %c4_145 = arith.constant 4 : index
    %233 = memref.load %arg2[%c3_144, %c4_145] : memref<4x9xf32, #tpu.memory_space<smem>>
    %234 = vector.broadcast %233 : f32 to vector<1x256xf32>
    %235 = arith.mulf %232, %234 : vector<1x256xf32>
    %236 = arith.addf %231, %235 : vector<1x256xf32>
    %c3_146 = arith.constant 3 : index
    %c129_147 = arith.constant 129 : index
    %237 = vector.load %arg10[%c3_146, %c129_147] : memref<4x512xf32, #tpu.memory_space<vmem>>, vector<1x256xf32>
    %238 = arith.mulf %237, %8 : vector<1x256xf32>
    %c3_148 = arith.constant 3 : index
    %c5_149 = arith.constant 5 : index
    %239 = memref.load %arg2[%c3_148, %c5_149] : memref<4x9xf32, #tpu.memory_space<smem>>
    %240 = vector.broadcast %239 : f32 to vector<1x256xf32>
    %241 = arith.mulf %238, %240 : vector<1x256xf32>
    %242 = arith.addf %236, %241 : vector<1x256xf32>
    %c3_150 = arith.constant 3 : index
    %c143_151 = arith.constant 143 : index
    %243 = vector.load %arg10[%c3_150, %c143_151] : memref<4x512xf32, #tpu.memory_space<vmem>>, vector<1x256xf32>
    %244 = arith.mulf %243, %7 : vector<1x256xf32>
    %c3_152 = arith.constant 3 : index
    %c6_153 = arith.constant 6 : index
    %245 = memref.load %arg2[%c3_152, %c6_153] : memref<4x9xf32, #tpu.memory_space<smem>>
    %246 = vector.broadcast %245 : f32 to vector<1x256xf32>
    %247 = arith.mulf %244, %246 : vector<1x256xf32>
    %248 = arith.addf %242, %247 : vector<1x256xf32>
    %c3_154 = arith.constant 3 : index
    %c144_155 = arith.constant 144 : index
    %249 = vector.load %arg10[%c3_154, %c144_155] : memref<4x512xf32, #tpu.memory_space<vmem>>, vector<1x256xf32>
    %c3_156 = arith.constant 3 : index
    %c7_157 = arith.constant 7 : index
    %250 = memref.load %arg2[%c3_156, %c7_157] : memref<4x9xf32, #tpu.memory_space<smem>>
    %251 = vector.broadcast %250 : f32 to vector<1x256xf32>
    %252 = arith.mulf %249, %251 : vector<1x256xf32>
    %253 = arith.addf %248, %252 : vector<1x256xf32>
    %c3_158 = arith.constant 3 : index
    %c145_159 = arith.constant 145 : index
    %254 = vector.load %arg10[%c3_158, %c145_159] : memref<4x512xf32, #tpu.memory_space<vmem>>, vector<1x256xf32>
    %255 = arith.mulf %254, %8 : vector<1x256xf32>
    %c3_160 = arith.constant 3 : index
    %c8_161 = arith.constant 8 : index
    %256 = memref.load %arg2[%c3_160, %c8_161] : memref<4x9xf32, #tpu.memory_space<smem>>
    %257 = vector.broadcast %256 : f32 to vector<1x256xf32>
    %258 = arith.mulf %255, %257 : vector<1x256xf32>
    %259 = arith.addf %253, %258 : vector<1x256xf32>
    %c3_162 = arith.constant 3 : index
    %260 = memref.load %arg3[%c3_162] : memref<4xf32, #tpu.memory_space<smem>>
    %261 = vector.broadcast %260 : f32 to vector<1x256xf32>
    %262 = arith.mulf %259, %261 : vector<1x256xf32>
    %c3_163 = arith.constant 3 : index
    %263 = memref.load %arg4[%c3_163] : memref<4xf32, #tpu.memory_space<smem>>
    %264 = vector.broadcast %263 : f32 to vector<1x256xf32>
    %265 = arith.addf %262, %264 : vector<1x256xf32>
    %cst_164 = arith.constant 0.000000e+00 : f32
    %266 = vector.broadcast %cst_164 : f32 to vector<1x256xf32>
    %267 = arith.maximumf %265, %266 : vector<1x256xf32>
    %c3_165 = arith.constant 3 : index
    %c0_166 = arith.constant 0 : index
    %c0_167 = arith.constant 0 : index
    %268 = vector.load %arg5[%c3_165, %c0_166, %c0_167] : memref<4x8x1xf32, #tpu.memory_space<vmem>>, vector<1x8x1xf32>
    %269 = vector.shape_cast %268 : vector<1x8x1xf32> to vector<8x1xf32>
    %270 = vector.broadcast %269 : vector<8x1xf32> to vector<8x256xf32>
    %271 = vector.broadcast %267 : vector<1x256xf32> to vector<8x256xf32>
    %272 = arith.mulf %270, %271 : vector<8x256xf32>
    %273 = arith.addf %207, %272 : vector<8x256xf32>
    %c0_168 = arith.constant 0 : index
    %c0_169 = arith.constant 0 : index
    %274 = vector.load %arg6[%c0_168, %c0_169] : memref<8x1xf32, #tpu.memory_space<vmem>>, vector<8x1xf32>
    %275 = vector.broadcast %274 : vector<8x1xf32> to vector<8x256xf32>
    %276 = arith.mulf %273, %275 : vector<8x256xf32>
    %c0_170 = arith.constant 0 : index
    %c0_171 = arith.constant 0 : index
    %277 = vector.load %arg7[%c0_170, %c0_171] : memref<8x1xf32, #tpu.memory_space<vmem>>, vector<8x1xf32>
    %278 = vector.broadcast %277 : vector<8x1xf32> to vector<8x256xf32>
    %279 = arith.addf %276, %278 : vector<8x256xf32>
    %cst_172 = arith.constant 0.000000e+00 : f32
    %280 = vector.broadcast %cst_172 : f32 to vector<8x256xf32>
    %281 = arith.maximumf %279, %280 : vector<8x256xf32>
    %c0_173 = arith.constant 0 : index
    %c0_174 = arith.constant 0 : index
    %c0_175 = arith.constant 0 : index
    %282 = vector.load %arg9[%c0_173, %c0_174, %c0_175] : memref<1x8x256xf32, #tpu.memory_space<vmem>>, vector<1x8x256xf32>
    %283 = vector.shape_cast %282 : vector<1x8x256xf32> to vector<8x256xf32>
    %284 = vector.shape_cast %281 : vector<8x256xf32> to vector<1x8x256xf32>
    tpu.vector_store %arg9[%c0_173, %c0_174, %c0_175], %284 {strides = array<i32>} : memref<1x8x256xf32, #tpu.memory_space<vmem>>, vector<1x8x256xf32>,
    return
  }
  func.func @transform_0(%arg0: i32) -> (i32, i32, i32) {
    %c0_i32 = arith.constant 0 : i32
    %c0_i32_0 = arith.constant 0 : i32
    %c0_i32_1 = arith.constant 0 : i32
    return %arg0, %c0_i32, %c0_i32_0 : i32, i32, i32
  }
  func.func @transform_1(%arg0: i32) -> (i32, i32) {
    %c0_i32 = arith.constant 0 : i32
    %c0_i32_0 = arith.constant 0 : i32
    %c0_i32_1 = arith.constant 0 : i32
    return %c0_i32, %c0_i32_0 : i32, i32
  }
  func.func @transform_2(%arg0: i32) -> i32 {
    %c0_i32 = arith.constant 0 : i32
    %c0_i32_0 = arith.constant 0 : i32
    return %c0_i32 : i32
  }
  func.func @transform_3(%arg0: i32) -> i32 {
    %c0_i32 = arith.constant 0 : i32
    %c0_i32_0 = arith.constant 0 : i32
    return %c0_i32 : i32
  }
  func.func @transform_4(%arg0: i32) -> (i32, i32, i32) {
    %c0_i32 = arith.constant 0 : i32
    %c0_i32_0 = arith.constant 0 : i32
    %c0_i32_1 = arith.constant 0 : i32
    %c0_i32_2 = arith.constant 0 : i32
    return %c0_i32, %c0_i32_0, %c0_i32_1 : i32, i32, i32
  }
  func.func @transform_5(%arg0: i32) -> (i32, i32) {
    %c0_i32 = arith.constant 0 : i32
    %c0_i32_0 = arith.constant 0 : i32
    %c0_i32_1 = arith.constant 0 : i32
    return %c0_i32, %c0_i32_0 : i32, i32
  }
  func.func @transform_6(%arg0: i32) -> (i32, i32) {
    %c0_i32 = arith.constant 0 : i32
    %c0_i32_0 = arith.constant 0 : i32
    %c0_i32_1 = arith.constant 0 : i32
    return %c0_i32, %c0_i32_0 : i32, i32
  }
  func.func @transform_7(%arg0: i32) -> (i32, i32) {
    %c0_i32 = arith.constant 0 : i32
    %c0_i32_0 = arith.constant 0 : i32
    %c0_i32_1 = arith.constant 0 : i32
    return %c0_i32, %c0_i32_0 : i32, i32
  }
  func.func @transform_8(%arg0: i32) -> (i32, i32, i32) {
    %c0_i32 = arith.constant 0 : i32
    %c0_i32_0 = arith.constant 0 : i32
    %c0_i32_1 = arith.constant 0 : i32
    return %arg0, %c0_i32, %c0_i32_0 : i32, i32, i32
  }
}

</mosaic_0001>

<bundles_post_ra>
// kernel: tpu_custom_call.1
= control target key start
LH: loop header
LB: loop body
LE: loop exit
PB: predicated region body
PF: predicated region fallthrough
CT: control target
= control target key end

     0   :  { %s1822_s0 = inlined_call_operand.vmem [shape: f32[2,4,256], index: 0, kind: input, shape index: {}]   ;;  %s1823_s1 = inlined_call_operand.vmem [shape: f32[4,9], index: 1, kind: input, shape index: {}]   ;;  %s1824_s2 = inlined_call_operand.vmem [shape: f32[4], index: 2, kind: input, shape index: {}]   ;;  %s1825_s3 = inlined_call_operand.vmem [shape: f32[4], index: 3, kind: input, shape index: {}]   ;;  %s1826_s4 = inlined_call_operand.vmem [shape: f32[4,8,1], index: 4, kind: input, shape index: {}]   ;;  %s1827_s5 = inlined_call_operand.vmem [shape: f32[8,1], index: 5, kind: input, shape index: {}]   ;;  %s1828_s6 = inlined_call_operand.vmem [shape: f32[8,1], index: 6, kind: input, shape index: {}]   ;;  %s1829_s7 = inlined_call_operand.vmem [shape: f32[3,256], index: 7, kind: input, shape index: {}]   ;;  %s1830_s8 = inlined_call_operand.hbm [shape: f32[2,8,256], index: 8, kind: output, shape index: {}]  }
   0x1   :  { %1836 = sst [smem:[#allocation13_spill]] %s1823_s1 }
   0x2   :  { %13 = vsyncpa [#allocation5], 0 }
   0x3   :  { %14 = vsyncpa [#allocation7], 0 }
   0x4   :  { %15 = vsyncpa [#allocation4], 0 }
   0x5   :  { %17 = vsyncpa [#allocation4 + $0x1], 0  ;;  %s1392_s27 = smov 0   ;;  %s1394_s28 = smov 0  }
   0x6   :  { %s1396_s29 = smov 0   ;;  %s1398_s30 = smov 0  }
   0x7 LB: > { %s1413_s9 = sadd.s32 4294967295, %s1327_s30   ;;  %s1061_s10 = sadd.s32 4294967294, %s1327_s30   ;;  %s1327_s30 = sphi %s1398_s30, %s1853_s30   ;;  %s1323_s29 = sphi %s1396_s29, %s1852_s29   ;;  %s1319_s28 = sphi %s1394_s28, %s1851_s28   ;;  %s1315_s27 = sphi %s1392_s27, %s1850_s27  }
   0x8   : > { %s1417_s11 = sadd.s32 1, %s1327_s30   ;;  %s203_s12 = sadd.s32 1, %s1323_s29 }
   0x9   : > { %s200_s13 = ssub.s32 %s1327_s30, %s1417_s11  ;;  %p213_p0 = scmp.ne.s32.totalorder %s1323_s29, %s1319_s28 }
   0xa   : > { %p201_p1 = scmp.eq.s32.totalorder %s200_s13, 0  ;;  %p214_p2 = scmp.eq.s32.totalorder %s1413_s9, 1 }
   0xb   : > { %p219_p3 = scmp.ne.s32.totalorder %s1319_s28, %s1315_s27  ;;  %p220_p4 = scmp.eq.s32.totalorder %s1061_s10, 1 }
   0xc   : > { %s1428_s14 = scalar_select %p201_p1, %s1323_s29, %s203_s12  }
   0xd   : > { %p1430_p5 = por %p214_p2, %p213_p0  ;;  %p1434_p6 = por %p220_p4, %p219_p3 }
   0xe   : > { %p1062_p7 = scmp.ge.s32.totalorder %s1327_s30, 1  ;;  %p227_p8 = scmp.lt.s32.totalorder %s1327_s30, 3 }
   0xf   : > { %s1837_s15 = scalar_select %p1430_p5, 1, 0 }
  0x10   : > { %s1838_s16 = scalar_select %p1434_p6, 1, 0 }
  0x11   : > { %p1831_p9 = scmp.eq.s32.totalorder %s1413_s9, 0  ;;  %p1441_p10 = pnand %p1062_p7, %p227_p8 }
  0x12   : > { %s251_s20 = sshll.u32 %s1824_s2, 4  ;;  %s1840_s1 = sld [smem:[#allocation13_spill]]  ;;  %s252_s20 = int_to_ptr.vmem [resolvable:$true] %s251_s20 }
  0x13   : > { %s1839_s17 = scalar_select %p1441_p10, 1, 0 }
  0x14   : > { %p1140_p11 = pneg %p1441_p10  ;;  %s262_s10 = sshll.u32 %s1825_s3, 4  ;;  %s1462_s10 = int_to_ptr.vmem [resolvable:$true] %s262_s10 }
  0x15   : > { %s1212_s12 = scalar_lea.vmem %s252_s20, 16  ;;  %p1220_p3 = scmp.lt.s32.totalorder %s252_s20, %s252_s20 }
  0x16   : > { %p1455_p12 = pnand %p1831_p9, %p1140_p11  ;;  %p1213_p13 = scmp.ne.s32.totalorder %s252_s20, %s1212_s12 }
  0x17   : > { %p1221_p4 = scmp.lt.s32.totalorder %s1212_s12, %s1212_s12 }
  0x18   : > { %s240_s23 = sshll.u32 %s1840_s1, 4  ;;  %p1214_p0 = pneg %p1455_p12  ;;  %s241_s23 = int_to_ptr.vmem [resolvable:$true] %s240_s23 }
  0x19   : > { %p1222_p7 = por %p1221_p4, %p1220_p3 }
  0x1a   : > { %p1215_p1 = pnand %p1214_p0, %p1213_p13 }
  0x1c   : > { %p1216_p2 = pneg %p1215_p1 }
  0x1e   : > { %p1223_p8 = pnand %p1222_p7, %p1216_p2 }
  0x20   : > { %1226 = shalt.err (!%p1223_p8)
}
  0x21   : > { %s1329_s13 = smov [#allocation6]   ;;  %s1227_s18 = scalar_lea.vmem %s241_s23, 64 }
  0x22   : > { %1146 = dma.vmem_to_smem (!%p1455_p12), %s252_s20, 16, %s1329_s13, [#allocation7]  }
  0x23   : > { %p1228_p11 = scmp.ne.s32.totalorder %s241_s23, %s1227_s18  ;;  %p1235_p5 = scmp.lt.s32.totalorder %s241_s23, %s241_s23 }
  0x24   : > { %p1236_p10 = scmp.lt.s32.totalorder %s1227_s18, %s1227_s18 }
  0x25   : > { %p1230_p9 = pnand %p1228_p11, %p1214_p0 }
  0x26   : > { %p1237_p13 = por %p1236_p10, %p1235_p5 }
  0x27   : > { %p1231_p6 = pneg %p1230_p9 }
  0x29   : > { %p1238_p1 = pnand %p1237_p13, %p1231_p6 }
  0x2b   : > { %1241 = shalt.err (!%p1238_p1)
}
  0x2c   : > { %s1330_s19 = smov [#allocation3]   ;;  %s1242_s20 = scalar_lea.vmem %s1462_s10, 16 }
  0x2d   : > { %1143 = dma.vmem_to_smem (!%p1455_p12), %s241_s23, 64, %s1330_s19, [#allocation5]  }
  0x2e   : > { %p1243_p2 = scmp.ne.s32.totalorder %s1462_s10, %s1242_s20  ;;  %p1250_p9 = scmp.lt.s32.totalorder %s1462_s10, %s1462_s10 }
  0x2f   : > { %p1251_p7 = scmp.lt.s32.totalorder %s1242_s20, %s1242_s20 }
  0x30   : > { %p1245_p3 = pnand %p1243_p2, %p1214_p0 }
  0x31   : > { %p1252_p5 = por %p1251_p7, %p1250_p9 }
  0x32   : > { %p1246_p4 = pneg %p1245_p3 }
  0x34   : > { %p1253_p6 = pnand %p1252_p5, %p1246_p4 }
  0x36   : > { %1256 = shalt.err (!%p1253_p6)
}
  0x37   : > { %s1331_s21 = smov [#allocation8]   ;;  %p1842_p10 = scmp.ne.s32.totalorder %s1839_s17, 0 }
  0x38   : > { %1149 = dma.vmem_to_smem (!%p1455_p12), %s1462_s10, 16, %s1331_s21, [#allocation7]  }
  0x39   : > { %295 = sbr.rel (%p1842_p10) target bundleno = 523 (0x20b), region = 52  ;;  %p1843_p8 = scmp.eq.s32.totalorder (!%p1842_p10), %s1413_s9, 0 }
  0x40   : > { %1302 = dma.done.wait (%p1843_p8), [#allocation5], 64   ;;  %p1844_p0 = pmov %p1843_p8 }
  0x42   : > { %1304 = vsyncadd (%p1844_p0), [#allocation5], 4294967232  ;;  %p1845_p11 = pmov %p1844_p0 }
  0x43   : > { %p1846_p13 = pmov %p1844_p0 }
  0x44   : > { %1306 = dma.done.wait (%p1845_p11), [#allocation7], 32  }
  0x45   : > { %1308 = vsyncadd (%p1846_p13), [#allocation7], 4294967264 }
  0x46   : > { %309 = sfence }
  0x47   : > { %v1074_v0 = vld [vmem:[%s1829_s7 + $0x2] ss:$4 sm:$0x3]  ;;  %s1332_s17 = smov 113   ;;  %v1333_v1 = vmov 0.0   ;;  %s1334_s26 = smov 1  }
  0x48   : > { %375 = vrot.lane.b32.xlu0 %v1074_v0, %s1332_s17  ;;  %343 = vst [vmem:[#allocation2] sm:$0xf] %v1333_v1  ;;  %344 = vst [vmem:[#allocation2 + $0xc] sm:$0xf] %v1333_v1  ;;  %424 = vrot.lane.b32.xlu1 %v1074_v0, %s1334_s26  ;;  %p338_p12 = scmp.lt.s32.totalorder %s1413_s9, 1  ;;  %s1834_s12 = smov 127  }
  0x49   : > { %v347_v2 = vld [vmem:[%s1829_s7] ss:$4 sm:$0x3]  ;;  %s1075_s13 = sld [smem:[#allocation3 + $0x1]]  ;;  %s1336_s18 = smov 15   ;;  %v1339_v32 = vmov 0  }
  0x4a   : > { %s339_s10 = scalar_select %p338_p12, %s1413_s9, 1  ;;  %1211 = vset.pattern.permute.xlu1 %v1339_v32  ;;  %1210 = vset.pattern.permute.xlu0 %v1339_v32  ;;  %vm378_vm0 = vcmask 924672   ;;  %vm370_vm1 = vcmask 1039360   ;;  %vm427_vm2 = vcmask 7168   ;;  %vm445_vm3 = vcmask 121856  }
  0x4b   : > { %s1084_s23 = sld [smem:[#allocation3 + $0x81]]  ;;  %s1337_s24 = smov 17   ;;  %vm474_vm4 = vcmask 138240   ;;  %vm355_vm5 = vcmask 908288   ;;  %vm389_vm6 = vcmask 1031168   ;;  %vm406_vm7 = vcmask 916480  }
  0x4c   : > { %393 = vrot.lane.b32.xlu0 %v347_v2, %s1834_s12  ;;  %442 = vrot.lane.b32.xlu1 %v347_v2, %s1336_s18  ;;  %s1124_s19 = sshll.u32 %s339_s10, 3  ;;  %s1096_s17 = sld [smem:[#allocation3 + $0x101]]  ;;  %vm438_vm8 = vcmask 900096   ;;  %vm456_vm9 = vcmask 785408   ;;  %vm467_vm10 = vcmask 777216   ;;  %vm485_vm11 = vcmask 769024  }
  0x4d   : > { %s342_s22 = scalar_lea.vmem %s1822_s0, %s1124_s19  ;;  %s1078_s25 = sld [smem:[#allocation3 + $0x4]] }
  0x4e   : > { %v345_v3 = vld [vmem:[%s342_s22] sm:$0xff]  ;;  %s1338_s26 = smov 111   ;;  %s1108_s12 = sld [smem:[#allocation3 + $0x181]] }
  0x4f   : > { %346 = vst [vmem:[#allocation2 + $0x4] sm:$0xff] %v345_v3  ;;  %s1099_s1 = sld [smem:[#allocation3 + $0x104]]  ;;  %v364_v4 = vstv %s1075_s13  ;;  %s1081_s18 = sld [smem:[#allocation3 + $0x7]] }
  0x50   : > { %471 = vrot.lane.b32.xlu0 %v1074_v0, %s1337_s24  ;;  %352 = vrot.lane.b32.xlu1 %v347_v2, %s1338_s26  ;;  %s1510_s10 = sld [smem:[#allocation3 + $0x84]]  ;;  %s1847_s19 = smov 127  }
  0x51   : > { %v532_v5 = vstv %s1084_s23  ;;  %s1111_s13 = sld [smem:[#allocation3 + $0x184]]  ;;  %s1102_s20 = sld [smem:[#allocation3 + $0x107]] }
  0x52   : > { %v664_v8 = vstv %s1096_s17  ;;  %s1090_s21 = sld [smem:[#allocation3 + $0x87]]  ;;  %s1076_s22 = sld [smem:[#allocation3 + $0x2]] }
  0x53   : > { %v413_v11 = vstv %s1078_s25  ;;  %s1545_s23 = sld [smem:[#allocation3 + $0x3]]  ;;  %s1549_s25 = sld [smem:[#allocation3 + $0x102]] }
  0x54   : > { %v796_v16 = vstv %s1108_s12  ;;  %s1085_s12 = sld [smem:[#allocation3 + $0x82]]  ;;  %s1547_s17 = sld [smem:[#allocation3 + $0x83]] }
  0x55   : > { %v698_v19 = vstv %s1099_s1  ;;  %v461_v25 = vstv %s1081_s18  ;;  %s1340_s1 = smov 95   ;;  %s1560_s18 = sld [smem:[#allocation3 + $0x103]] }
  0x56   : > { %v1512_v6 = vld [vmem:[#allocation2] ss:$4 sm:$0x7]  ;;  %v1514_v7 = vld [vmem:[#allocation2 + $0x2] ss:$4 sm:$0x7]  ;;  %v566_v23 = vstv %s1510_s10 }
  0x57   : > { %v365_v9 = vmul.f32 %v364_v4, %v1512_v6  ;;  %v1517_v10 = vld [vmem:[#allocation2 + $0x1] ss:$4 sm:$0x7]  ;;  %v411_v13 = vld [vmem:[#allocation2 + $0x4] ss:$4 sm:$0x3]  ;;  %v665_v14 = vmul.f32 %v664_v8, %v1514_v7  ;;  %v830_v29 = vstv %s1111_s13  ;;  %v732_v31 = vstv %s1102_s20 }
  0x58   : > { %v533_v12 = vmul.f32 %v532_v5, %v1517_v10  ;;  %v1523_v15 = vld [vmem:[#allocation2 + $0x3] ss:$4 sm:$0x7]  ;;  %v414_v17 = vmul.f32 %v413_v11, %v411_v13  ;;  %v696_v18 = vld [vmem:[#allocation2 + $0x6] ss:$4 sm:$0x3]  ;;  %v600_v36 = vstv %s1090_s21  ;;  %v383_v42 = vstv %s1076_s22 }
  0x59   : > { %367 = vrot.lane.b32.xlu0 %v365_v9, %s1847_s19  ;;  %v797_v20 = vmul.f32 %v796_v16, %v1523_v15  ;;  %v699_v21 = vmul.f32 %v698_v19, %v696_v18  ;;  %v564_v22 = vld [vmem:[#allocation2 + $0x5] ss:$4 sm:$0x3]  ;;  %v1529_v24 = vld [vmem:[#allocation2 + $0x4] ss:$4 sm:$0x7]  ;;  %v400_v52 = vstv %s1545_s23  ;;  %v675_v61 = vstv %s1549_s25 }
  0x5a   : > { %535 = vrot.lane.b32.xlu1 %v533_v12, %s1847_s19  ;;  %v567_v26 = vmul.f32 %v566_v23, %v564_v22  ;;  %v462_v27 = vmul.f32 %v461_v25, %v1529_v24  ;;  %v828_v28 = vld [vmem:[#allocation2 + $0x7] ss:$4 sm:$0x3]  ;;  %v1534_v30 = vld [vmem:[#allocation2 + $0x6] ss:$4 sm:$0x7]  ;;  %v543_v41 = vstv %s1085_s12  ;;  %v554_v53 = vstv %s1547_s17 }
  0x5b   : > { %v831_v33 = vmul.f32 %v830_v29, %v828_v28  ;;  %v733_v34 = vmul.f32 %v732_v31, %v1534_v30  ;;  %v1539_v35 = vld [vmem:[#allocation2 + $0x5] ss:$4 sm:$0x7]  ;;  %s1555_s10 = sld [smem:[#allocation3 + $0x85]]  ;;  %s1342_s20 = smov 112   ;;  %v686_v8 = vstv %s1560_s18 }
  0x5c   : > { %v601_v37 = vmul.f32 %v600_v36, %v1539_v35  ;;  %s1567_s13 = sld [smem:[#allocation3 + $0x5]]  ;;  %s1571_s21 = sld [smem:[#allocation3 + $0x183]] }
  0x5d   : > { %667 = vrot.lane.b32.xlu0 %v665_v14, %s1847_s19  ;;  %s1578_s12 = sld [smem:[#allocation3 + $0x6]]  ;;  %s1585_s23 = sld [smem:[#allocation3 + $0x105]] }
  0x5e   : > { %416 = vrot.lane.b32.xlu1 %v414_v17, %s1338_s26  ;;  %s1580_s22 = sld [smem:[#allocation3 + $0x86]]  ;;  %s1589_s17 = sld [smem:[#allocation3 + $0x185]] }
  0x5f   : > { %s1343_s25 = smov 110   ;;  %s1082_s18 = sld [smem:[#allocation3 + $0x8]] }
  0x60   : > { %p1848_p2 = scmp.ne.s32.totalorder %s1837_s15, 0 }
  0x61   : > { %799 = vrot.lane.b32.xlu0 %v797_v20, %s1847_s19  ;;  %s1341_s19 = smov 126   ;;  %v579_v3 = vstv %s1555_s10  ;;  %s1101_s10 = sld [smem:[#allocation3 + $0x106]] }
  0x62   : > { %701 = vrot.lane.b32.xlu1 %v699_v21, %s1338_s26  ;;  %v432_v16 = vstv %s1567_s13  ;;  %v818_v18 = vstv %s1571_s21  ;;  %s1113_s13 = sld [smem:[#allocation3 + $0x186]]  ;;  %s1103_s21 = sld [smem:[#allocation3 + $0x108]] }
  0x63   : > { %v450_v25 = vstv %s1578_s12  ;;  %s1345_s12 = smov 94  }
  0x64   : > { %v843_v36 = vstv %s1589_s17  ;;  %s1661_s17 = sld [smem:[#allocation3 + $0x100]] }
  0x65   : > { %569 = vrot.lane.b32.xlu0 %v567_v26, %s1338_s26  ;;  %v840_v26 = vld [vmem:[#allocation2 + $0x7] ss:$4 sm:$0x7] }
  0x66   : > { %464 = vrot.lane.b32.xlu1 %v462_v27, %s1340_s1  ;;  %v590_v27 = vstv %s1580_s22  ;;  %s1115_s22 = sld [smem:[#allocation3 + $0x188]] }
  0x69   : > { %833 = vrot.lane.b32.xlu0 %v831_v33, %s1338_s26  ;;  %s1553_s26 = sld [smem:[#allocation3 + $0x182]] }
  0x6a   : > { %735 = vrot.lane.b32.xlu1 %v733_v34, %s1340_s1  ;;  %v711_v34 = vstv %s1585_s23  ;;  %s1083_s23 = sld [smem:[#allocation3 + $0x80]] }
  0x6d   : > { %603 = vrot.lane.b32.xlu0 %v601_v37, %s1340_s1 }
  0x6f   : > { %v807_v62 = vstv %s1553_s26  ;;  %s1593_s26 = sld [smem:[#allocation3 + $0x88]] }
  0xba   : > { %v376_v38 = vpop.permute.xlu0 %375  ;;  %v425_v43 = vpop.permute.xlu1 %424 }
  0xbb   : > { %v377_v39 = vrot.slane %v376_v38, 7  ;;  %v426_v50 = vrot.slane %v425_v43, 7 }
  0xbd   : > { %v379_v40 = vsel %vm378_vm0, %v377_v39, %v376_v38  ;;  %v428_v57 = vsel %vm427_vm2, %v426_v50, %v425_v43 }
  0xbe   : > { %v381_v44 = vmul.f32 %v379_v40, %v1512_v6  ;;  %v541_v45 = vmul.f32 %v1517_v10, %v379_v40  ;;  %v394_v46 = vpop.permute.xlu0 %393  ;;  %v673_v56 = vmul.f32 %v1514_v7, %v379_v40  ;;  %v805_v60 = vmul.f32 %v1523_v15, %v379_v40  ;;  %v443_v63 = vpop.permute.xlu1 %442 }
  0xbf   : > { %v395_v47 = vrot.slane %v394_v46, 7  ;;  %v577_v0 = vmul.f32 %v1539_v35, %v428_v57  ;;  %v444_v5 = vrot.slane %v443_v63, 7  ;;  %v430_v11 = vmul.f32 %v428_v57, %v1529_v24 }
  0xc0   : > { %v544_v48 = vmul.f32 %v543_v41, %v541_v45  ;;  %v384_v49 = vmul.f32 %v383_v42, %v381_v44  ;;  %v676_v2 = vmul.f32 %v675_v61, %v673_v56  ;;  %v808_v4 = vmul.f32 %v807_v62, %v805_v60  ;;  %v496_v56 = vld [vmem:[%s1826_s4] sm:$0xff] }
  0xc1   : > { %v396_v51 = vsel %vm370_vm1, %v395_v47, %v394_v46  ;;  %v580_v9 = vmul.f32 %v579_v3, %v577_v0  ;;  %v446_v14 = vsel %vm445_vm3, %v444_v5, %v443_v63  ;;  %v433_v20 = vmul.f32 %v432_v16, %v430_v11  ;;  %v929_v60 = vld [vmem:[%s1828_s6] sm:$0xff] }
  0xc2   : > { %v398_v54 = vmul.f32 %v396_v51, %v1512_v6  ;;  %v552_v55 = vmul.f32 %v1517_v10, %v396_v51  ;;  %546 = vrot.lane.b32.xlu1 %v544_v48, %s1341_s19  ;;  %386 = vrot.lane.b32.xlu0 %v384_v49, %s1341_s19  ;;  %v684_v1 = vmul.f32 %v1514_v7, %v396_v51  ;;  %v472_v17 = vpop.permute.xlu0 %471  ;;  %v611_v40 = vstv %s1593_s26  ;;  %v920_v61 = vld [vmem:[%s1827_s5] sm:$0xff]  ;;  %v353_v62 = vpop.permute.xlu1 %352  ;;  %s1702_s26 = sld [smem:[#allocation6]] }
  0xc3   : > { %v816_v13 = vmul.f32 %v1523_v15, %v396_v51  ;;  %v448_v19 = vmul.f32 %v446_v14, %v1529_v24  ;;  %v473_v21 = vrot.slane %v472_v17, 7  ;;  %v588_v22 = vmul.f32 %v1539_v35, %v446_v14  ;;  %v1094_v51 = vld [vmem:[%s1826_s4 + $0x8] sm:$0xff] }
  0xc4   : > { %v401_v58 = vmul.f32 %v400_v52, %v398_v54  ;;  %v555_v59 = vmul.f32 %v554_v53, %v552_v55  ;;  %v687_v12 = vmul.f32 %v686_v8, %v684_v1  ;;  %v709_v28 = vmul.f32 %v1534_v30, %v428_v57 }
  0xc5   : > { %v819_v23 = vmul.f32 %v818_v18, %v816_v13  ;;  %v475_v29 = vsel %vm474_vm4, %v473_v21, %v472_v17  ;;  %v451_v31 = vmul.f32 %v450_v25, %v448_v19  ;;  %v841_v32 = vmul.f32 %v840_v26, %v428_v57 }
  0xc6   : > { %403 = vrot.lane.b32.xlu1 %v401_v58, %s1342_s20  ;;  %557 = vrot.lane.b32.xlu0 %v555_v59, %s1342_s20  ;;  %v591_v33 = vmul.f32 %v590_v27, %v588_v22  ;;  %v609_v37 = vmul.f32 %v1539_v35, %v475_v29  ;;  %v720_v38 = vmul.f32 %v1534_v30, %v446_v14  ;;  %v722_v42 = vstv %s1101_s10  ;;  %v1118_v59 = vld [vmem:[%s1826_s4 + $0x18] sm:$0xff]  ;;  %s1709_s10 = sld [smem:[#allocation6 + $0x1]] }
  0xc7   : > { %v712_v39 = vmul.f32 %v711_v34, %v709_v28  ;;  %v844_v41 = vmul.f32 %v843_v36, %v841_v32  ;;  %v477_v44 = vmul.f32 %v475_v29, %v1529_v24  ;;  %v852_v46 = vmul.f32 %v840_v26, %v446_v14 }
  0xc8   : > { %v612_v43 = vmul.f32 %v611_v40, %v609_v37  ;;  %v723_v45 = vmul.f32 %v722_v42, %v720_v38  ;;  %v479_v47 = vstv %s1082_s18  ;;  %v854_v35 = vstv %s1113_s13  ;;  %s1717_s18 = sld [smem:[#allocation8]]  ;;  %s1739_s13 = sld [smem:[#allocation6 + $0x2]] }
  0xc9   : > { %v480_v48 = vmul.f32 %v479_v47, %v477_v44  ;;  %v855_v50 = vmul.f32 %v854_v35, %v852_v46  ;;  %v741_v24 = vmul.f32 %v1534_v30, %v475_v29  ;;  %v743_v53 = vstv %s1103_s21  ;;  %v1106_v30 = vld [vmem:[%s1826_s4 + $0x10] sm:$0xff]  ;;  %s1758_s21 = sld [smem:[#allocation8 + $0x3]] }
  0xca   : > { %678 = vrot.lane.b32.xlu1 %v676_v2, %s1341_s19  ;;  %810 = vrot.lane.b32.xlu0 %v808_v4, %s1341_s19  ;;  %s1344_s19 = smov 96   ;;  %v873_v54 = vmul.f32 %v840_v26, %v475_v29  ;;  %v875_v57 = vstv %s1115_s22  ;;  %v354_v21 = vrot.slane %v353_v62, 7  ;;  %s335_s22 = sand.u32 1, %s1319_s28  }
  0xcb   : > { %v744_v55 = vmul.f32 %v743_v53, %v741_v24  ;;  %v368_v63 = vpop.permute.xlu0 %367 }
  0xcc   : > { %v876_v58 = vmul.f32 %v875_v57, %v873_v54  ;;  %v536_v0 = vpop.permute.xlu1 %535  ;;  %v356_v25 = vsel %vm355_vm5, %v354_v21, %v353_v62  ;;  %v369_v29 = vrot.slane %v368_v63, 1 }
  0xcd   : > { %v358_v27 = vmul.f32 %v356_v25, %v1512_v6  ;;  %v526_v32 = vmul.f32 %v1517_v10, %v356_v25  ;;  %v537_v34 = vrot.slane %v536_v0, 1  ;;  %v658_v46 = vmul.f32 %v1514_v7, %v356_v25 }
  0xce   : > { %689 = vrot.lane.b32.xlu1 %v687_v12, %s1342_s20  ;;  %582 = vrot.lane.b32.xlu0 %v580_v9, %s1343_s25  ;;  %v790_v7 = vmul.f32 %v1523_v15, %v356_v25 }
  0xcf   : > { %v1630_v1 = vpop.permute.xlu0 %667  ;;  %v538_v10 = vsel %vm370_vm1, %v536_v0, %v537_v34 }
  0xd0   : > { %v1632_v2 = vpop.permute.xlu1 %416 }
  0xd1   : > { %v418_v53 = vrot.slane %v1632_v2, 7 }
  0xd2   : > { %435 = vrot.lane.b32.xlu1 %v433_v20, %s1343_s25  ;;  %821 = vrot.lane.b32.xlu0 %v819_v23, %s1342_s20  ;;  %s1114_s20 = sld [smem:[#allocation3 + $0x187]] }
  0xd3   : > { %v1634_v3 = vpop.permute.xlu0 %799 }
  0xd4   : > { %v1638_v5 = vpop.permute.xlu1 %701 }
  0xd6   : > { %453 = vrot.lane.b32.xlu1 %v451_v31, %s1344_s19  ;;  %593 = vrot.lane.b32.xlu0 %v591_v33, %s1344_s19  ;;  %v528_v33 = vstv %s1083_s23  ;;  %s1125_s23 = sshll.u32 %s1413_s9, 8  ;;  %s957_s9 = scalar_lea.sflag [#allocation4], %s335_s22 }
  0xd7   : > { %v1636_v4 = vpop.permute.xlu0 %569  ;;  %v529_v42 = vmul.f32 %v528_v33, %v526_v32 }
  0xd8   : > { %v864_v49 = vstv %s1114_s20  ;;  %v1642_v9 = vpop.permute.xlu1 %464  ;;  %s1752_s20 = sld [smem:[#allocation6 + $0x3]] }
  0xd9   : > { %v865_v52 = vmul.f32 %v864_v49, %v840_v26  ;;  %v669_v49 = vrot.slane %v1630_v1, 1 }
  0xda   : > { %714 = vrot.lane.b32.xlu1 %v712_v39, %s1343_s25  ;;  %846 = vrot.lane.b32.xlu0 %v844_v41, %s1343_s25  ;;  %s1663_s25 = sld [smem:[#allocation3 + $0x180]]  ;;  %v371_v39 = vsel %vm370_vm1, %v368_v63, %v369_v29 }
  0xdb   : > { %v1640_v8 = vpop.permute.xlu0 %833  ;;  %v670_v62 = vsel %vm370_vm1, %v1630_v1, %v669_v49 }
  0xdc   : > { %v1646_v12 = vpop.permute.xlu1 %735 }
  0xde   : > { %725 = vrot.lane.b32.xlu1 %v723_v45, %s1344_s19  ;;  %614 = vrot.lane.b32.xlu0 %v612_v43, %s1345_s12 }
  0xdf   : > { %v1644_v11 = vpop.permute.xlu0 %603 }
  0xe0   : > { %v792_v24 = vstv %s1663_s25 }
  0xe2   : > { %482 = vrot.lane.b32.xlu1 %v480_v48, %s1345_s12  ;;  %857 = vrot.lane.b32.xlu0 %v855_v50, %s1344_s19  ;;  %v660_v48 = vstv %s1661_s17  ;;  %v540_v50 = vadd.f32 %v538_v10, %v529_v42  ;;  %s1727_s19 = sld [smem:[#allocation8 + $0x1]] }
  0xe6   : > { %631 = vperm.xlu1 %1211, %v1094_v51   ;;  %867 = vrot.lane.b32.xlu0 %v865_v52, %s1340_s1  ;;  %s1745_s1 = sld [smem:[#allocation8 + $0x2]] }
  0xea   : > { %746 = vrot.lane.b32.xlu1 %v744_v55, %s1345_s12  ;;  %499 = vperm.xlu0 %1210, %v496_v56  }
  0xee   : > { %878 = vrot.lane.b32.xlu1 %v876_v58, %s1345_s12  ;;  %895 = vperm.xlu0 %1210, %v1118_v59   ;;  %s359_s12 = sld [smem:[#allocation3]]  ;;  %v661_v59 = vmul.f32 %v660_v48, %v658_v46 }
  0xf2   : > { %763 = vperm.xlu1 %1211, %v1106_v30   ;;  %932 = vperm.xlu0 %1210, %v929_v60   ;;  %v571_v30 = vrot.slane %v1636_v4, 7 }
  0xf4   : > { %v360_v31 = vstv %s359_s12  ;;  %v572_v1 = vsel %vm355_vm5, %v571_v30, %v1636_v4  ;;  %s1071_s12 = sshll.u32 %s335_s22, 4 }
  0xf5   : > { %v361_v37 = vmul.f32 %v360_v31, %v358_v27  ;;  %v672_v27 = vadd.f32 %v670_v62, %v661_v59  ;;  %s337_s17 = scalar_lea.vmem [#allocation9], %s1071_s12 }
  0xf6   : > { %923 = vperm.xlu1 %1211, %v920_v61   ;;  %s971_s25 = sshll.u32 %s337_s17, 4  ;;  %s1781_s25 = int_to_ptr.vmem [resolvable:$true] %s971_s25 }
  0xf7   : > { %v373_v45 = vadd.f32 %v371_v39, %v361_v37 }
 0x134   : > { %v547_v13 = vpop.permute.xlu1 %546  ;;  %v387_v14 = vpop.permute.xlu0 %386 }
 0x135   : > { %v388_v36 = vrot.slane %v387_v14, 1  ;;  %v548_v6 = vrot.slane %v547_v13, 1 }
 0x137   : > { %v390_v43 = vsel %vm389_vm6, %v387_v14, %v388_v36  ;;  %v549_v47 = vsel %vm389_vm6, %v547_v13, %v548_v6  ;;  %v419_v13 = vsel %vm355_vm5, %v418_v53, %v1632_v2  ;;  %v801_v2 = vrot.slane %v1634_v3, 1 }
 0x138   : > { %v404_v16 = vpop.permute.xlu1 %403  ;;  %v558_v17 = vpop.permute.xlu0 %557  ;;  %v392_v51 = vadd.f32 %v390_v43, %v373_v45  ;;  %v551_v57 = vadd.f32 %v549_v47, %v540_v50  ;;  %v466_v36 = vrot.slane %v1642_v9, 7 }
 0x139   : > { %v405_v40 = vrot.slane %v404_v16, 1  ;;  %v559_v44 = vrot.slane %v558_v17, 1 }
 0x13b   : > { %v407_v35 = vsel %vm406_vm7, %v404_v16, %v405_v40  ;;  %v560_v54 = vsel %vm406_vm7, %v558_v17, %v559_v44  ;;  %v793_v16 = vmul.f32 %v792_v24, %v790_v7  ;;  %v703_v40 = vrot.slane %v1638_v5, 7 }
 0x13c   : > { %v1648_v18 = vpop.permute.xlu1 %678  ;;  %v1650_v19 = vpop.permute.xlu0 %810  ;;  %v409_v58 = vadd.f32 %v407_v35, %v392_v51  ;;  %v562_v63 = vadd.f32 %v560_v54, %v551_v57 }
 0x13d   : > { %v680_v0 = vrot.slane %v1648_v18, 1  ;;  %v704_v51 = vsel %vm355_vm5, %v703_v40, %v1638_v5  ;;  %v835_v5 = vrot.slane %v1640_v8, 7 }
 0x13e   : > { %v421_v21 = vadd.f32 %v419_v13, %v409_v58  ;;  %v574_v33 = vadd.f32 %v572_v1, %v562_v63  ;;  %v490_v58 = vstv %s1702_s26  ;;  %v737_v63 = vrot.slane %v1646_v12, 7 }
 0x13f   : > { %v624_v1 = vstv %s1727_s19  ;;  %s1346_s19 = smov [#allocation9]  }
 0x140   : > { %v1652_v20 = vpop.permute.xlu1 %689  ;;  %v1654_v22 = vpop.permute.xlu0 %582 }
 0x141   : > { %v584_v60 = vrot.slane %v1654_v22, 7  ;;  %v691_v17 = vrot.slane %v1652_v20, 1 }
 0x143   : > { %v585_v29 = vsel %vm438_vm8, %v584_v60, %v1654_v22  ;;  %v812_v22 = vrot.slane %v1650_v19, 1 }
 0x144   : > { %v436_v23 = vpop.permute.xlu1 %435  ;;  %v1657_v26 = vpop.permute.xlu0 %821  ;;  %v587_v39 = vadd.f32 %v585_v29, %v574_v33 }
 0x145   : > { %v437_v55 = vrot.slane %v436_v23, 7  ;;  %v823_v43 = vrot.slane %v1657_v26, 1  ;;  %v813_v48 = vsel %vm389_vm6, %v1650_v19, %v812_v22 }
 0x147   : > { %v439_v15 = vsel %vm438_vm8, %v437_v55, %v436_v23  ;;  %v681_v23 = vsel %vm389_vm6, %v1648_v18, %v680_v0  ;;  %v605_v18 = vrot.slane %v1644_v11, 7  ;;  %v824_v53 = vsel %vm406_vm7, %v1657_v26, %v823_v43 }
 0x148   : > { %v454_v28 = vpop.permute.xlu1 %453  ;;  %v594_v41 = vpop.permute.xlu0 %593  ;;  %v441_v34 = vadd.f32 %v439_v15, %v421_v21  ;;  %v683_v42 = vadd.f32 %v681_v23, %v672_v27  ;;  %v885_v43 = vstv %s1752_s20 }
 0x149   : > { %v455_v61 = vrot.slane %v454_v28, 7  ;;  %v595_v14 = vrot.slane %v594_v41, 7 }
 0x14b   : > { %v457_v31 = vsel %vm456_vm9, %v455_v61, %v454_v28  ;;  %v596_v37 = vsel %vm456_vm9, %v595_v14, %v594_v41  ;;  %v692_v28 = vsel %vm406_vm7, %v1652_v20, %v691_v17  ;;  %v802_v41 = vsel %vm370_vm1, %v1634_v3, %v801_v2 }
 0x14c   : > { %v1665_v38 = vpop.permute.xlu1 %714  ;;  %v1680_v56 = vpop.permute.xlu0 %846  ;;  %v459_v6 = vadd.f32 %v457_v31, %v441_v34  ;;  %v598_v44 = vadd.f32 %v596_v37, %v587_v39  ;;  %v468_v20 = vsel %vm467_vm10, %v466_v36, %v1642_v9  ;;  %v694_v46 = vadd.f32 %v692_v28, %v683_v42 }
 0x14d   : > { %v716_v45 = vrot.slane %v1665_v38, 7  ;;  %v804_v50 = vadd.f32 %v802_v41, %v793_v16  ;;  %v606_v9 = vsel %vm467_vm10, %v605_v18, %v1644_v11  ;;  %v848_v11 = vrot.slane %v1680_v56, 7 }
 0x14e   : > { %v470_v49 = vadd.f32 %v468_v20, %v459_v6  ;;  %v608_v54 = vadd.f32 %v606_v9, %v598_v44  ;;  %v706_v57 = vadd.f32 %v704_v51, %v694_v46  ;;  %v621_v61 = vstv %s1709_s10 }
 0x14f   : > { %v717_v19 = vsel %vm438_vm8, %v716_v45, %v1665_v38  ;;  %v815_v7 = vadd.f32 %v813_v48, %v804_v50  ;;  %v493_v14 = vstv %s1717_s18  ;;  %v503_v16 = vlaneseq  ;;  %s1779_s18 = scalar_lea.hbm %s1830_s8, %s1125_s23 }
 0x150   : > { %v1675_v52 = vpop.permute.xlu1 %725  ;;  %v615_v32 = vpop.permute.xlu0 %614  ;;  %v719_v60 = vadd.f32 %v717_v19, %v706_v57  ;;  %v849_v17 = vsel %vm438_vm8, %v848_v11, %v1680_v56  ;;  %v738_v31 = vsel %vm467_vm10, %v737_v63, %v1646_v12  ;;  %v753_v37 = vstv %s1739_s13  ;;  %s1261_s13 = sshll.u32 %s1346_s19, 4  ;;  %s1262_s13 = int_to_ptr.vmem [resolvable:$false] %s1261_s13 }
 0x151   : > { %v616_v10 = vrot.slane %v615_v32, 7  ;;  %v727_v3 = vrot.slane %v1675_v52, 7  ;;  %v826_v26 = vadd.f32 %v824_v53, %v815_v7  ;;  %v504_v56 = vshrl.u32 %v503_v16, 7  ;;  %p1264_p9 = scmp.lt.s32.totalorder %s1781_s25, %s1262_s13 }
 0x152   : > { %v756_v6 = vstv %s1745_s1  ;;  %s1263_s1 = scalar_lea.vmem %s1262_s13, 512 }
 0x153   : > { %v617_v24 = vsel %vm485_vm11, %v616_v10, %v615_v32  ;;  %v728_v59 = vsel %vm456_vm9, %v727_v3, %v1675_v52  ;;  %v836_v52 = vsel %vm355_vm5, %v835_v5, %v1640_v8  ;;  %v505_v41 = vsub.s32 0, %v504_v56 }
 0x154   : > { %v483_v25 = vpop.permute.xlu1 %482  ;;  %v858_v35 = vpop.permute.xlu0 %857  ;;  %v619_v30 = vadd.f32 %v617_v24, %v608_v54  ;;  %v730_v15 = vadd.f32 %v728_v59, %v719_v60  ;;  %v838_v27 = vadd.f32 %v836_v52, %v826_v26  ;;  %v888_v3 = vstv %s1758_s21 }
 0x155   : > { %v484_v4 = vrot.slane %v483_v25, 7  ;;  %v859_v13 = vrot.slane %v858_v35, 7 }
 0x156   : > { %v622_v21 = vmul.f32 %v621_v61, %v619_v30  ;;  %v851_v8 = vadd.f32 %v849_v17, %v838_v27  ;;  %v740_v33 = vadd.f32 %v738_v31, %v730_v15 }
 0x157   : > { %v486_v47 = vsel %vm485_vm11, %v484_v4, %v483_v25  ;;  %v860_v2 = vsel %vm456_vm9, %v859_v13, %v858_v35  ;;  %v513_v35 = vsub.s32 2, %v504_v56 }
 0x158   : > { %v488_v55 = vadd.f32 %v486_v47, %v470_v49  ;;  %v868_v38 = vpop.permute.xlu0 %867  ;;  %v625_v34 = vadd.f32 %v624_v1, %v622_v21  ;;  %v862_v22 = vadd.f32 %v860_v2, %v851_v8  ;;  %v509_v47 = vsub.s32 1, %v504_v56 }
 0x159   : > { %v869_v25 = vrot.slane %v868_v38, 7 }
 0x15a   : > { %v491_v0 = vmul.f32 %v490_v58, %v488_v55  ;;  %v626_v10 = vmax.f32 %v625_v34, 0.0 }
 0x15b   : > { %v870_v36 = vsel %vm467_vm10, %v869_v25, %v868_v38 }
 0x15c   : > { %v494_v32 = vadd.f32 %v493_v14, %v491_v0  ;;  %v872_v18 = vadd.f32 %v870_v36, %v862_v22  ;;  %v638_v51 = vrot.slane %v626_v10, %v505_v41  ;;  %v642_v57 = vrot.slane %v626_v10, %v509_v47 }
 0x15d   : > { %v646_v58 = vrot.slane %v626_v10, %v513_v35 }
 0x15e   : > { %v495_v39 = vmax.f32 %v494_v32, 0.0 }
 0x160   : > { %v506_v48 = vrot.slane %v495_v39, %v505_v41  ;;  %v510_v9 = vrot.slane %v495_v39, %v509_v47  ;;  %v514_v24 = vrot.slane %v495_v39, %v513_v35 }
 0x165   : > { %v1742_v62 = vpop.permute.xlu1 %631 }
 0x166   : > { %v650_v30 = vmul.f32 %v638_v51, %v1742_v62  ;;  %v651_v61 = vmul.f32 %v642_v57, %v1742_v62  ;;  %v652_v38 = vmul.f32 %v646_v58, %v1742_v62 }
 0x169   : > { %v747_v29 = vpop.permute.xlu1 %746  ;;  %v500_v20 = vpop.permute.xlu0 %499 }
 0x16a   : > { %v748_v23 = vrot.slane %v747_v29, 7  ;;  %v518_v53 = vmul.f32 %v506_v48, %v500_v20  ;;  %v519_v5 = vmul.f32 %v510_v9, %v500_v20  ;;  %v520_v11 = vmul.f32 %v514_v24, %v500_v20 }
 0x16c   : > { %v749_v4 = vsel %vm485_vm11, %v748_v23, %v747_v29  ;;  %v653_v13 = vadd.f32 %v650_v30, %v518_v53  ;;  %v654_v14 = vadd.f32 %v651_v61, %v519_v5  ;;  %v655_v16 = vadd.f32 %v652_v38, %v520_v11 }
 0x16d   : > { %v751_v28 = vadd.f32 %v749_v4, %v740_v33  ;;  %v879_v12 = vpop.permute.xlu1 %878  ;;  %v896_v21 = vpop.permute.xlu0 %895 }
 0x16e   : > { %v880_v40 = vrot.slane %v879_v12, 7 }
 0x16f   : > { %v754_v42 = vmul.f32 %v753_v37, %v751_v28 }
 0x170   : > { %v881_v44 = vsel %vm485_vm11, %v880_v40, %v879_v12 }
 0x171   : > { %v757_v45 = vadd.f32 %v756_v6, %v754_v42  ;;  %v883_v46 = vadd.f32 %v881_v44, %v872_v18  ;;  %v764_v59 = vpop.permute.xlu1 %763  ;;  %v933_v36 = vpop.permute.xlu0 %932 }
 0x173   : > { %v758_v49 = vmax.f32 %v757_v45, 0.0  ;;  %v886_v50 = vmul.f32 %v885_v43, %v883_v46 }
 0x175   : > { %v889_v19 = vadd.f32 %v888_v3, %v886_v50  ;;  %v770_v54 = vrot.slane %v758_v49, %v505_v41  ;;  %v774_v55 = vrot.slane %v758_v49, %v509_v47  ;;  %v778_v7 = vrot.slane %v758_v49, %v513_v35  ;;  %v924_v23 = vpop.permute.xlu1 %923 }
 0x177   : > { %v890_v26 = vmax.f32 %v889_v19, 0.0  ;;  %v782_v60 = vmul.f32 %v770_v54, %v764_v59  ;;  %v783_v63 = vmul.f32 %v774_v55, %v764_v59  ;;  %v784_v0 = vmul.f32 %v778_v7, %v764_v59 }
 0x179   : > { %v902_v15 = vrot.slane %v890_v26, %v505_v41  ;;  %v906_v52 = vrot.slane %v890_v26, %v509_v47  ;;  %v910_v17 = vrot.slane %v890_v26, %v513_v35  ;;  %v785_v25 = vadd.f32 %v782_v60, %v653_v13 }
 0x17a   : > { %v786_v1 = vadd.f32 %v783_v63, %v654_v14  ;;  %v787_v29 = vadd.f32 %v784_v0, %v655_v16 }
 0x17b   : > { %v914_v27 = vmul.f32 %v902_v15, %v896_v21  ;;  %v915_v31 = vmul.f32 %v906_v52, %v896_v21  ;;  %v916_v32 = vmul.f32 %v910_v17, %v896_v21 }
 0x17d   : > { %v917_v2 = vadd.f32 %v914_v27, %v785_v25  ;;  %v918_v8 = vadd.f32 %v915_v31, %v786_v1  ;;  %v919_v62 = vadd.f32 %v916_v32, %v787_v29 }
 0x17f   : > { %v926_v56 = vmul.f32 %v924_v23, %v917_v2  ;;  %v927_v33 = vmul.f32 %v924_v23, %v918_v8  ;;  %v928_v34 = vmul.f32 %v924_v23, %v919_v62 }
 0x181   : > { %v935_v37 = vadd.f32 %v933_v36, %v926_v56  ;;  %v936_v4 = vadd.f32 %v933_v36, %v927_v33  ;;  %v937_v22 = vadd.f32 %v933_v36, %v928_v34 }
 0x183   : > { %v938_v28 = vmax.f32 %v935_v37, 0.0  ;;  %v939_v12 = vmax.f32 %v936_v4, 0.0  ;;  %v940_v39 = vmax.f32 %v937_v22, 0.0 }
 0x185   : > { %944 = vrot.lane.b32.xlu1 %v938_v28, %s1337_s24  ;;  %946 = vrot.lane.b32.xlu0 %v939_v12, %s1337_s24 }
 0x189   : > { %948 = vrot.lane.b32.xlu1 %v940_v39, %s1337_s24  ;;  %s1257_s24 = scalar_lea.vmem %s1781_s25, 256 }
 0x18a   : > { %p1258_p1 = scmp.ne.s32.totalorder %s1781_s25, %s1257_s24  ;;  %p1265_p7 = scmp.lt.s32.totalorder %s1263_s1, %s1257_s24 }
 0x18c   : > { %p1259_p3 = pnand %p1258_p1, %p1848_p2  ;;  %p1266_p5 = por %p1265_p7, %p1264_p9 }
 0x18e   : > { %p1260_p4 = pneg %p1259_p3 }
 0x190   : > { %p1267_p6 = pnand %p1266_p5, %p1260_p4 }
 0x1f7   : > { %v945_v6 = vpop.permute.xlu1 %944  ;;  %v947_v40 = vpop.permute.xlu0 %946 }
 0x1f8   : > { %v950_v18 = vsel %vm474_vm4, %v945_v6, %v947_v40 }
 0x1f9   : > { %954 = vst [vmem:[%s337_s17] sm:$0xff] %v950_v18 }
 0x1fb   : > { %v949_v42 = vpop.permute.xlu1 %948 }
 0x1fc   : > { %v951_v10 = vsel %vm474_vm4, %v947_v40, %v949_v42 }
 0x1fd   : > { %955 = vst [vmem:[%s337_s17 + $0x8] sm:$0xff] %v951_v10 }
 0x1fe   : > { %1270 = shalt.err (!%p1267_p6)
}
 0x1ff   : > { %s1271_s20 = scalar_lea.hbm %s1779_s18, 256  ;;  %s1275_s12 = scalar_lea.hbm %s1830_s8, 512 }
 0x200   : > { %p1272_p10 = scmp.ne.s32.totalorder %s1779_s18, %s1271_s20  ;;  %p1276_p11 = scmp.lt.u32.totalorder %s1779_s18, %s1830_s8 }
 0x201   : > { %p1277_p13 = scmp.lt.u32.totalorder %s1275_s12, %s1271_s20  ;;  %p1279_p1 = scmp.lt.u32.totalorder %s1271_s20, %s1779_s18 }
 0x202   : > { %p1273_p8 = pnand %p1272_p10, %p1848_p2 }
 0x203   : > { %p1278_p12 = por %p1277_p13, %p1276_p11 }
 0x204   : > { %p1274_p0 = pneg %p1273_p8 }
 0x205   : > { %p1280_p3 = por %p1279_p1, %p1278_p12 }
 0x207   : > { %p1281_p4 = pnand %p1280_p3, %p1274_p0 }
 0x209   : > { %1284 = shalt.err (!%p1281_p4)
}
 0x20a   : > { %1138 = dma.vmem_to_hbm [thread:$0]  (%p1848_p2), %s1781_s25, 256, %s1779_s18, %s957_s9  }
 0x20b PF: > { %p1160_p9 = scmp.ge.s32.totalorder %s1327_s30, 2  ;;  %s983_s26 = sand.u32 1, %s1315_s27  }
 0x20c   : > { %p1849_p7 = scmp.ne.s32.totalorder %s1838_s16, 0  ;;  %s984_s10 = scalar_lea.sflag [#allocation4], %s983_s26 }
 0x20e   : > { %p1151_p5 = pnand %p1160_p9, %p1849_p7 }
 0x210   : > { %1310 = dma.done.wait (!%p1151_p5), %s984_s10, 256  }
 0x211   : > { %1312 = vsyncadd (!%p1151_p5), %s984_s10, 4294967040  ;;  %p20_p6 = scmp.ge.s32.totalorder %s1417_s11, 4   ;;  %s1850_s27 = smov %s1319_s28 }
 0x212   : > { %s1851_s28 = smov %s1323_s29  ;;  %s1852_s29 = smov %s1428_s14 }
 0x213   : > { %s1853_s30 = smov %s1417_s11  ;;  %22 = sbr.rel (!%p20_p6) target bundleno = 7 (0x7), region = 115 }
 0x21a   :  { %989 = vsyncpa [#allocation4], 1 }
 0x21b   :  { %991 = vsyncpa [#allocation4 + $0x1], 1 }
 0x21c   :  { %992 = vsyncpa [#allocation5], 1 }
 0x21d   :  { %994 = vsyncpa [#allocation5 + $0x1], 1 }
 0x21e   :  { %995 = vsyncpa [#allocation7], 1 }

</bundles_post_ra>
